<compile_context>
chip_gen: v7x
topology: tpu7x:2x2x1
jax: 0.10.0
libtpu: 0.0.40
codegen_flags: <defaults>
</compile_context>

<pallas_src>
import jax
import jax.numpy as jnp
from jax.experimental import pallas as pl
from jax.experimental.pallas import tpu as pltpu

N_HIDDEN_1 = 2048
N_HIDDEN_2 = 512
NUM_CLASSES = 2
CLASS_PAD = 128    # pad class dim of the last layer to one lane width (dense MXU matmul)


def _mlp_softmax_kernel(x_ref, w1_ref, b1_ref, w2_ref, b2_ref, w3_ref, b3_ref,
                        logits_ref, probs_ref):
    # One batch tile: fused 3-layer MLP (bf16 MXU matmuls, f32 accumulation),
    # then a 2-class softmax on the two valid lanes.
    x = x_ref[...].astype(jnp.bfloat16)                                     # f32 HBM read, bf16 MXU feed
    h1 = jnp.dot(x, w1_ref[...], preferred_element_type=jnp.float32) + b1_ref[...]
    h2 = jnp.dot(h1.astype(jnp.bfloat16), w2_ref[...],
                 preferred_element_type=jnp.float32) + b2_ref[...]
    logits = jnp.dot(h2.astype(jnp.bfloat16), w3_ref[...],
                     preferred_element_type=jnp.float32) + b3_ref[...]      # (tb, 128) f32

    # Only lanes 0..1 are valid (padded w3/b3 columns are zero).
    logits_ref[...] = logits[:, :NUM_CLASSES]

    # 2-class softmax as a sigmoid: p1 = 1/(1+exp(l0-l1)), p0 = 1-p1.
    # (exp overflow/underflow saturates to the correct 0/1 limits.)
    d = logits[:, 0:1] - logits[:, 1:2]
    p1 = pl.reciprocal(1.0 + jnp.exp(d), approx=True)        # EUP slots, effectively free
    probs_ref[...] = jnp.concatenate([1.0 - p1, p1], axis=1)


def prepare_params(w1, b1, w2, b2, w3, b3):
    """One-time (outside the forward) param prep: pad the 2-class dim of layer 3
    up to 128 zero lanes, reshape biases to (1, N), cast weights to bf16 for the
    MXU (accumulation stays f32)."""
    w1p = jnp.asarray(w1, jnp.float32).astype(jnp.bfloat16)
    w2p = jnp.asarray(w2, jnp.float32).astype(jnp.bfloat16)
    w3p = (jnp.zeros((N_HIDDEN_2, CLASS_PAD), jnp.float32)
           .at[:, :NUM_CLASSES].set(jnp.asarray(w3, jnp.float32))
           .astype(jnp.bfloat16))
    b1r = jnp.asarray(b1, jnp.float32).reshape(1, N_HIDDEN_1)
    b2r = jnp.asarray(b2, jnp.float32).reshape(1, N_HIDDEN_2)
    b3p = (jnp.zeros((1, CLASS_PAD), jnp.float32)
           .at[:, :NUM_CLASSES].set(jnp.asarray(b3, jnp.float32).reshape(1, -1)))
    return w1p, b1r, w2p, b2r, w3p, b3p


def _vmem_capacity_bytes():
    try:
        return int(pltpu.get_tpu_info().vmem_capacity_bytes)
    except Exception:
        return 64 << 20       # conservative fallback: v7x per-TensorCore VMEM


def _tile_and_vmem_limit(batch, embed):
    """Generation-aware batch tile and vmem_limit_bytes."""
    cap = _vmem_capacity_bytes()
    if cap >= (128 << 20):        # v5e / v6e: 128 MiB physical VMEM
        vmem_limit = 96 << 20
        max_tile = 1024
    else:                          # v7x: 64 MiB per TensorCore
        vmem_limit = 32 << 20
        max_tile = 512

    # Resident weights: bf16, single-buffered + f32 biases.
    weight_bytes = (2 * (embed * N_HIDDEN_1 + N_HIDDEN_1 * N_HIDDEN_2
                         + N_HIDDEN_2 * CLASS_PAD)
                    + 4 * (N_HIDDEN_1 + N_HIDDEN_2 + CLASS_PAD))
    # Per batch-row VMEM: f32 x tile (double-buffered) + f32 intermediates + outputs.
    per_row = (2 * 4 * embed + 4 * (N_HIDDEN_1 + N_HIDDEN_2 + CLASS_PAD)
               + 2 * 2 * NUM_CLASSES * 4)
    budget = vmem_limit - weight_bytes - (2 << 20)   # headroom for compiler scratch
    # TODO(synk): for very large embedding_dim (w1 no longer resident in VMEM),
    # add a K-tiled "arbitrary" grid axis for layer 1 instead of holding w1 whole.
    if budget > 0:
        max_tile = max(8, min(max_tile, (budget // per_row) // 8 * 8))

    if batch > max_tile:
        tb = max_tile
    else:
        # At least two batch tiles when possible so ("parallel",) can shard the
        # grid across v7x's two TensorCores.
        tb = max(8, min(max_tile, ((-(-batch // 2)) + 7) // 8 * 8))
    return tb, vmem_limit


@jax.jit
def discriminator_forward(x, w1, b1, w2, b2, w3p, b3p):
    """x: (B, E) float32. Weights already processed by prepare_params().
    Returns (logits (B, 2), probs (B, 2)), both float32."""
    B, E = x.shape
    tb, vmem_limit = _tile_and_vmem_limit(B, E)
    nb = pl.cdiv(B, tb)

    # Constant-index weights: single-buffered (they stay resident, no re-DMA).
    weight_mode = {"pipeline_mode": pl.Buffered(1)} if hasattr(pl, "Buffered") else {}

    def wspec(shape):
        return pl.BlockSpec(shape, lambda i: (0, 0), **weight_mode)

    flops = 2 * nb * tb * (E * N_HIDDEN_1 + N_HIDDEN_1 * N_HIDDEN_2
                           + N_HIDDEN_2 * CLASS_PAD)
    bytes_accessed = (x.size * 4 + w1.size * 2 + w2.size * 2 + w3p.size * 2
                      + b1.size * 4 + b2.size * 4 + b3p.size * 4
                      + 2 * B * NUM_CLASSES * 4)

    logits, probs = pl.pallas_call(
        _mlp_softmax_kernel,
        out_shape=(
            jax.ShapeDtypeStruct((B, NUM_CLASSES), jnp.float32),
            jax.ShapeDtypeStruct((B, NUM_CLASSES), jnp.float32),
        ),
        grid=(nb,),
        in_specs=[
            pl.BlockSpec((tb, E), lambda i: (i, 0)),     # x streams (double-buffered)
            wspec((E, N_HIDDEN_1)),
            wspec((1, N_HIDDEN_1)),
            wspec((N_HIDDEN_1, N_HIDDEN_2)),
            wspec((1, N_HIDDEN_2)),
            wspec((N_HIDDEN_2, CLASS_PAD)),
            wspec((1, CLASS_PAD)),
        ],
        out_specs=(
            pl.BlockSpec((tb, NUM_CLASSES), lambda i: (i, 0)),
            pl.BlockSpec((tb, NUM_CLASSES), lambda i: (i, 0)),
        ),
        compiler_params=pltpu.CompilerParams(
            dimension_semantics=("parallel",),
            vmem_limit_bytes=vmem_limit,
        ),
        cost_estimate=pl.CostEstimate(
            flops=flops,
            transcendentals=nb * tb,
            bytes_accessed=bytes_accessed,
        ),
    )(x, w1, b1, w2, b2, w3p, b3p)
    return logits, probs


def init_params(key, embedding_dim):
    """Deterministic init mimicking torch.nn.Linear default U(-1/sqrt(fan_in), +)."""
    ks = jax.random.split(key, 6)

    def lin(kw, kb, fan_in, fan_out):
        bound = 1.0 / jnp.sqrt(fan_in)
        w = jax.random.uniform(kw, (fan_in, fan_out), jnp.float32, -bound, bound)
        b = jax.random.uniform(kb, (fan_out,), jnp.float32, -bound, bound)
        return w, b

    w1, b1 = lin(ks[0], ks[1], embedding_dim, N_HIDDEN_1)
    w2, b2 = lin(ks[2], ks[3], N_HIDDEN_1, N_HIDDEN_2)
    w3, b3 = lin(ks[4], ks[5], N_HIDDEN_2, NUM_CLASSES)
    return w1, b1, w2, b2, w3, b3


# TODO(synk): get_loss/step (CrossEntropyLoss + Adam) are training-side and not
# part of the forward pass; they are intentionally not translated.

if __name__ == "__main__":
    key = jax.random.PRNGKey(0)
    kx, kp = jax.random.split(key)

    batch = 8
    embedding_dim = 32

    x = jax.random.normal(kx, (batch, embedding_dim), jnp.float32)
    raw = init_params(kp, embedding_dim)

    # Hoisted, one-time parameter preparation (padding / bf16 cast).
    params = jax.block_until_ready(prepare_params(*raw))

    logits, probs = discriminator_forward(x, *params)
    jax.block_until_ready((logits, probs))

    # Pure-JAX reference using the same bf16-matmul / f32-accumulate recipe.
    w1, b1, w2, b2, w3, b3 = raw
    xb = x.astype(jnp.bfloat16)
    h1 = jnp.dot(xb, w1.astype(jnp.bfloat16), preferred_element_type=jnp.float32) + b1
    h2 = jnp.dot(h1.astype(jnp.bfloat16), w2.astype(jnp.bfloat16),
                 preferred_element_type=jnp.float32) + b2
    ref_logits = jnp.dot(h2.astype(jnp.bfloat16), w3.astype(jnp.bfloat16),
                         preferred_element_type=jnp.float32) + b3
    ref_probs = jax.nn.softmax(ref_logits, axis=1)

    assert logits.shape == (batch, NUM_CLASSES) and probs.shape == (batch, NUM_CLASSES)
    assert jnp.allclose(logits, ref_logits, atol=2e-3, rtol=2e-3), (
        "logits mismatch, max abs err = %g" % float(jnp.max(jnp.abs(logits - ref_logits))))
    # Note: pl.reciprocal(approx=True) -> probs differ from exact softmax by ~1e-4.
    assert jnp.allclose(probs, ref_probs, atol=2e-3, rtol=2e-3), (
        "probs mismatch, max abs err = %g" % float(jnp.max(jnp.abs(probs - ref_probs))))

    print("KERNEL_OK")
</pallas_src>

<mosaic_0001>
module attributes {stable_mosaic.version = 11 : i64} {
  func.func @_mlp_softmax_kernel(%arg0: i32, %arg1: memref<8x32xf32, #tpu.memory_space<vmem>>, %arg2: memref<32x2048xbf16, #tpu.memory_space<vmem>>, %arg3: memref<1x2048xf32, #tpu.memory_space<vmem>>, %arg4: memref<2048x512xbf16, #tpu.memory_space<vmem>>, %arg5: memref<1x512xf32, #tpu.memory_space<vmem>>, %arg6: memref<512x128xbf16, #tpu.memory_space<vmem>>, %arg7: memref<1x128xf32, #tpu.memory_space<vmem>>, %arg8: memref<8x2xf32, #tpu.memory_space<vmem>>, %arg9: memref<8x2xf32, #tpu.memory_space<vmem>>) attributes {dimension_semantics = [#tpu.dimension_semantics<parallel>], iteration_bounds = array<i64: 1>, scalar_prefetch = 0 : i64, scratch_operands = 0 : i64, tpu.core_type = #tpu.core_type<tc>, window_params = [{transform_indices = @transform_0, window_bounds = array<i64: 8, 32>}, {pipeline_mode = #tpu.pipeline_mode<synchronous>, transform_indices = @transform_1, window_bounds = array<i64: 32, 2048>}, {pipeline_mode = #tpu.pipeline_mode<synchronous>, transform_indices = @transform_2, window_bounds = array<i64: 1, 2048>}, {pipeline_mode = #tpu.pipeline_mode<synchronous>, transform_indices = @transform_3, window_bounds = array<i64: 2048, 512>}, {pipeline_mode = #tpu.pipeline_mode<synchronous>, transform_indices = @transform_4, window_bounds = array<i64: 1, 512>}, {pipeline_mode = #tpu.pipeline_mode<synchronous>, transform_indices = @transform_5, window_bounds = array<i64: 512, 128>}, {pipeline_mode = #tpu.pipeline_mode<synchronous>, transform_indices = @transform_6, window_bounds = array<i64: 1, 128>}, {transform_indices = @transform_7, window_bounds = array<i64: 8, 2>}, {transform_indices = @transform_8, window_bounds = array<i64: 8, 2>}]} {
    %c0 = arith.constant 0 : index
    %c0_0 = arith.constant 0 : index
    %0 = vector.load %arg1[%c0, %c0_0] : memref<8x32xf32, #tpu.memory_space<vmem>>, vector<8x32xf32>
    %1 = arith.truncf %0 : vector<8x32xf32> to vector<8x32xbf16>
    %c0_1 = arith.constant 0 : index
    %c0_2 = arith.constant 0 : index
    %2 = vector.load %arg2[%c0_1, %c0_2] : memref<32x2048xbf16, #tpu.memory_space<vmem>>, vector<32x2048xbf16>
    %cst = arith.constant dense<0.000000e+00> : vector<8x2048xf32>
    %3 = tpu.matmul %1, %2, %cst {dimension_numbers = #tpu.dot_dimension_numbers<[1], [0], [0], [1], [0, 0, 1, 1], [], []>} : vector<8x32xbf16>, vector<32x2048xbf16>, vector<8x2048xf32> -> vector<8x2048xf32>
    %c0_3 = arith.constant 0 : index
    %c0_4 = arith.constant 0 : index
    %4 = vector.load %arg3[%c0_3, %c0_4] : memref<1x2048xf32, #tpu.memory_space<vmem>>, vector<1x2048xf32>
    %5 = vector.broadcast %4 : vector<1x2048xf32> to vector<8x2048xf32>
    %6 = arith.addf %3, %5 : vector<8x2048xf32>
    %7 = arith.truncf %6 : vector<8x2048xf32> to vector<8x2048xbf16>
    %c0_5 = arith.constant 0 : index
    %c0_6 = arith.constant 0 : index
    %8 = vector.load %arg4[%c0_5, %c0_6] : memref<2048x512xbf16, #tpu.memory_space<vmem>>, vector<2048x512xbf16>
    %cst_7 = arith.constant dense<0.000000e+00> : vector<8x512xf32>
    %9 = tpu.matmul %7, %8, %cst_7 {dimension_numbers = #tpu.dot_dimension_numbers<[1], [0], [0], [1], [0, 0, 1, 1], [], []>} : vector<8x2048xbf16>, vector<2048x512xbf16>, vector<8x512xf32> -> vector<8x512xf32>
    %c0_8 = arith.constant 0 : index
    %c0_9 = arith.constant 0 : index
    %10 = vector.load %arg5[%c0_8, %c0_9] : memref<1x512xf32, #tpu.memory_space<vmem>>, vector<1x512xf32>
    %11 = vector.broadcast %10 : vector<1x512xf32> to vector<8x512xf32>
    %12 = arith.addf %9, %11 : vector<8x512xf32>
    %13 = arith.truncf %12 : vector<8x512xf32> to vector<8x512xbf16>
    %c0_10 = arith.constant 0 : index
    %c0_11 = arith.constant 0 : index
    %14 = vector.load %arg6[%c0_10, %c0_11] : memref<512x128xbf16, #tpu.memory_space<vmem>>, vector<512x128xbf16>
    %cst_12 = arith.constant dense<0.000000e+00> : vector<8x128xf32>
    %15 = tpu.matmul %13, %14, %cst_12 {dimension_numbers = #tpu.dot_dimension_numbers<[1], [0], [0], [1], [0, 0, 1, 1], [], []>} : vector<8x512xbf16>, vector<512x128xbf16>, vector<8x128xf32> -> vector<8x128xf32>
    %c0_13 = arith.constant 0 : index
    %c0_14 = arith.constant 0 : index
    %16 = vector.load %arg7[%c0_13, %c0_14] : memref<1x128xf32, #tpu.memory_space<vmem>>, vector<1x128xf32>
    %17 = vector.broadcast %16 : vector<1x128xf32> to vector<8x128xf32>
    %18 = arith.addf %15, %17 : vector<8x128xf32>
    %19 = vector.extract_strided_slice %18 {offsets = [0, 0], sizes = [8, 2], strides = [1, 1]} : vector<8x128xf32> to vector<8x2xf32>
    %c0_15 = arith.constant 0 : index
    %c0_16 = arith.constant 0 : index
    %20 = vector.load %arg8[%c0_15, %c0_16] : memref<8x2xf32, #tpu.memory_space<vmem>>, vector<8x2xf32>
    tpu.vector_store %arg8[%c0_15, %c0_16], %19 {strides = array<i32>} : memref<8x2xf32, #tpu.memory_space<vmem>>, vector<8x2xf32>,
    %21 = vector.extract_strided_slice %18 {offsets = [0, 0], sizes = [8, 1], strides = [1, 1]} : vector<8x128xf32> to vector<8x1xf32>
    %22 = vector.extract_strided_slice %18 {offsets = [0, 1], sizes = [8, 1], strides = [1, 1]} : vector<8x128xf32> to vector<8x1xf32>
    %23 = arith.subf %21, %22 : vector<8x1xf32>
    %24 = math.exp %23 : vector<8x1xf32>
    %cst_17 = arith.constant 1.000000e+00 : f32
    %25 = vector.broadcast %cst_17 : f32 to vector<8x1xf32>
    %26 = arith.addf %25, %24 : vector<8x1xf32>
    %27 = tpu.reciprocal %26 {approx = true} : vector<8x1xf32> -> vector<8x1xf32>
    %cst_18 = arith.constant 1.000000e+00 : f32
    %28 = vector.broadcast %cst_18 : f32 to vector<8x1xf32>
    %29 = arith.subf %28, %27 : vector<8x1xf32>
    %30 = tpu.concatenate %29, %27 in 1 : vector<8x1xf32>, vector<8x1xf32> -> vector<8x2xf32>
    %c0_19 = arith.constant 0 : index
    %c0_20 = arith.constant 0 : index
    %31 = vector.load %arg9[%c0_19, %c0_20] : memref<8x2xf32, #tpu.memory_space<vmem>>, vector<8x2xf32>
    tpu.vector_store %arg9[%c0_19, %c0_20], %30 {strides = array<i32>} : memref<8x2xf32, #tpu.memory_space<vmem>>, vector<8x2xf32>,
    return
  }
  func.func @transform_0(%arg0: i32) -> (i32, i32) {
    %c0_i32 = arith.constant 0 : i32
    %c0_i32_0 = arith.constant 0 : i32
    return %arg0, %c0_i32 : i32, i32
  }
  func.func @transform_1(%arg0: i32) -> (i32, i32) {
    %c0_i32 = arith.constant 0 : i32
    %c0_i32_0 = arith.constant 0 : i32
    %c0_i32_1 = arith.constant 0 : i32
    return %c0_i32, %c0_i32_0 : i32, i32
  }
  func.func @transform_2(%arg0: i32) -> (i32, i32) {
    %c0_i32 = arith.constant 0 : i32
    %c0_i32_0 = arith.constant 0 : i32
    %c0_i32_1 = arith.constant 0 : i32
    return %c0_i32, %c0_i32_0 : i32, i32
  }
  func.func @transform_3(%arg0: i32) -> (i32, i32) {
    %c0_i32 = arith.constant 0 : i32
    %c0_i32_0 = arith.constant 0 : i32
    %c0_i32_1 = arith.constant 0 : i32
    return %c0_i32, %c0_i32_0 : i32, i32
  }
  func.func @transform_4(%arg0: i32) -> (i32, i32) {
    %c0_i32 = arith.constant 0 : i32
    %c0_i32_0 = arith.constant 0 : i32
    %c0_i32_1 = arith.constant 0 : i32
    return %c0_i32, %c0_i32_0 : i32, i32
  }
  func.func @transform_5(%arg0: i32) -> (i32, i32) {
    %c0_i32 = arith.constant 0 : i32
    %c0_i32_0 = arith.constant 0 : i32
    %c0_i32_1 = arith.constant 0 : i32
    return %c0_i32, %c0_i32_0 : i32, i32
  }
  func.func @transform_6(%arg0: i32) -> (i32, i32) {
    %c0_i32 = arith.constant 0 : i32
    %c0_i32_0 = arith.constant 0 : i32
    %c0_i32_1 = arith.constant 0 : i32
    return %c0_i32, %c0_i32_0 : i32, i32
  }
  func.func @transform_7(%arg0: i32) -> (i32, i32) {
    %c0_i32 = arith.constant 0 : i32
    %c0_i32_0 = arith.constant 0 : i32
    return %arg0, %c0_i32 : i32, i32
  }
  func.func @transform_8(%arg0: i32) -> (i32, i32) {
    %c0_i32 = arith.constant 0 : i32
    %c0_i32_0 = arith.constant 0 : i32
    return %arg0, %c0_i32 : i32, i32
  }
}

</mosaic_0001>

<bundles_post_ra>
// kernel: discriminator_forward.1
= control target key start
LH: loop header
LB: loop body
LE: loop exit
PB: predicated region body
PF: predicated region fallthrough
CT: control target
= control target key end

     0   :  { %14 = vsyncpa [#allocation3], 0  ;;  %s6827_s0 = inlined_call_operand.hbm [shape: f32[8,32], index: 0, kind: input, shape index: {}]   ;;  %s6828_s1 = inlined_call_operand.hbm [shape: bf16[32,2048], index: 1, kind: input, shape index: {}]   ;;  %s6829_s2 = inlined_call_operand.hbm [shape: f32[1,2048], index: 2, kind: input, shape index: {}]   ;;  %s6830_s3 = inlined_call_operand.hbm [shape: bf16[2048,512], index: 3, kind: input, shape index: {}]   ;;  %s6831_s4 = inlined_call_operand.hbm [shape: f32[1,512], index: 4, kind: input, shape index: {}]   ;;  %s6832_s5 = inlined_call_operand.hbm [shape: bf16[512,128], index: 5, kind: input, shape index: {}]   ;;  %s6833_s6 = inlined_call_operand.hbm [shape: f32[1,128], index: 6, kind: input, shape index: {}]   ;;  %s6834_s7 = inlined_call_operand.vmem [shape: f32[8,2], index: 7, kind: output, shape index: {0}]   ;;  %s6835_s8 = inlined_call_operand.vmem [shape: f32[8,2], index: 8, kind: output, shape index: {1}]  }
   0x1   :  { %15 = vsyncpa [#allocation5], 0 }
   0x2   :  { %16 = vsyncpa [#allocation8], 0 }
   0x3   :  { %17 = vsyncpa [#allocation11], 0  ;;  %s6542_s27 = smov [#allocation4]   ;;  %s6380_s9 = scalar_lea.hbm %s6828_s1, 4096 }
   0x4   :  { %s33_s28 = sshll.u32 %s6542_s27, 4  ;;  %p6381_p0 = scmp.ne.s32.totalorder %s6828_s1, %s6380_s9  ;;  %s34_s28 = int_to_ptr.vmem [resolvable:$true] %s33_s28 }
   0x5   :  { %p6384_p1 = scmp.lt.u32.totalorder %s6380_s9, %s6828_s1 }
   0x7   :  { %p6386_p2 = pnand %p6384_p1, %p6381_p0 }
   0x9   :  { %6389 = shalt.err (!%p6386_p2)
}
   0xa   :  { %s6390_s14 = scalar_lea.vmem %s34_s28, 4096  ;;  %p6395_p4 = scmp.lt.s32.totalorder %s34_s28, %s34_s28 }
   0xb   :  { %p6391_p3 = scmp.ne.s32.totalorder %s34_s28, %s6390_s14  ;;  %p6396_p5 = scmp.lt.s32.totalorder %s6390_s14, %s6390_s14 }
   0xd   :  { %p6397_p6 = por %p6396_p5, %p6395_p4 }
   0xf   :  { %p6398_p7 = pnand %p6397_p6, %p6391_p3 }
  0x11   :  { %6401 = shalt.err (!%p6398_p7)
}
  0x12   :  { %s6543_s15 = smov 1024   ;;  %s6544_s16 = smov 64  }
  0x13   :  { %39 = dma.hbm_to_vmem [thread:$0]  %s6828_s1, 4096, %s34_s28, [#allocation5], %s6543_s15, %s6543_s15, %s6544_s16  }
  0x14   :  { %s6545_s19 = smov [#allocation7]   ;;  %s6402_s23 = scalar_lea.hbm %s6830_s3, 65536 }
  0x15   :  { %s55_s20 = sshll.u32 %s6545_s19, 4  ;;  %p6403_p8 = scmp.ne.s32.totalorder %s6830_s3, %s6402_s23  ;;  %s56_s20 = int_to_ptr.vmem [resolvable:$true] %s55_s20 }
  0x16   :  { %p6406_p9 = scmp.lt.u32.totalorder %s6402_s23, %s6830_s3 }
  0x18   :  { %p6408_p10 = pnand %p6406_p9, %p6403_p8 }
  0x1a   :  { %6411 = shalt.err (!%p6408_p10)
}
  0x1b   :  { %s6412_s29 = scalar_lea.vmem %s56_s20, 65536  ;;  %p6417_p12 = scmp.lt.s32.totalorder %s56_s20, %s56_s20 }
  0x1c   :  { %p6413_p11 = scmp.ne.s32.totalorder %s56_s20, %s6412_s29  ;;  %p6418_p13 = scmp.lt.s32.totalorder %s6412_s29, %s6412_s29 }
  0x1e   :  { %p6419_p0 = por %p6418_p13, %p6417_p12 }
  0x20   :  { %p6420_p1 = pnand %p6419_p0, %p6413_p11 }
  0x22   :  { %6423 = shalt.err (!%p6420_p1)
}
  0x23   :  { %s6546_s1 = smov 256   ;;  %s6547_s28 = smov 16  }
  0x24   :  { %61 = dma.hbm_to_vmem [thread:$0]  %s6830_s3, 65536, %s56_s20, [#allocation8], %s6546_s1, %s6546_s1, %s6547_s28  }
  0x25   :  { %s6548_s10 = smov [#allocation10]   ;;  %s6549_s12 = smov [#allocation2]  }
  0x26   :  { %s77_s11 = sshll.u32 %s6548_s10, 4  ;;  %s24_s13 = sshll.u32 %s6549_s12, 4  ;;  %s78_s11 = int_to_ptr.vmem [resolvable:$true] %s77_s11  ;;  %s25_s13 = int_to_ptr.vmem [resolvable:$true] %s24_s13 }
  0x27   :  { %s6424_s17 = scalar_lea.hbm %s6832_s5, 4096 }
  0x28   :  { %p6425_p2 = scmp.ne.s32.totalorder %s6832_s5, %s6424_s17  ;;  %p6428_p3 = scmp.lt.u32.totalorder %s6424_s17, %s6832_s5 }
  0x2a   :  { %p6430_p4 = pnand %p6428_p3, %p6425_p2 }
  0x2c   :  { %6433 = shalt.err (!%p6430_p4)
}
  0x2d   :  { %s6434_s3 = scalar_lea.vmem %s78_s11, 4096  ;;  %p6439_p6 = scmp.lt.s32.totalorder %s78_s11, %s78_s11 }
  0x2e   :  { %p6435_p5 = scmp.ne.s32.totalorder %s78_s11, %s6434_s3  ;;  %p6440_p7 = scmp.lt.s32.totalorder %s6434_s3, %s6434_s3 }
  0x30   :  { %p6441_p8 = por %p6440_p7, %p6439_p6 }
  0x32   :  { %p6442_p9 = pnand %p6441_p8, %p6435_p5 }
  0x34   :  { %6445 = shalt.err (!%p6442_p9)
}
  0x35   :  { %s6550_s20 = smov 4   ;;  %s6446_s27 = scalar_lea.hbm %s6827_s0, 128 }
  0x36   :  { %83 = dma.hbm_to_vmem [thread:$0]  %s6832_s5, 4096, %s78_s11, [#allocation11], %s6544_s16, %s6544_s16, %s6550_s20  }
  0x37   :  { %p6447_p10 = scmp.ne.s32.totalorder %s6827_s0, %s6446_s27  ;;  %p6450_p11 = scmp.lt.u32.totalorder %s6446_s27, %s6827_s0 }
  0x39   :  { %p6452_p12 = pnand %p6450_p11, %p6447_p10 }
  0x3b   :  { %6455 = shalt.err (!%p6452_p12)
}
  0x3c   :  { %s6456_s9 = scalar_lea.vmem %s25_s13, 128  ;;  %p6461_p0 = scmp.lt.s32.totalorder %s25_s13, %s25_s13 }
  0x3d   :  { %p6457_p13 = scmp.ne.s32.totalorder %s25_s13, %s6456_s9  ;;  %p6462_p1 = scmp.lt.s32.totalorder %s6456_s9, %s6456_s9 }
  0x3f   :  { %p6463_p2 = por %p6462_p1, %p6461_p0 }
  0x41   :  { %p6464_p3 = pnand %p6463_p2, %p6457_p13 }
  0x43   :  { %6467 = shalt.err (!%p6464_p3)
}
  0x44   :  { %27 = dma.hbm_to_vmem [thread:$0]  %s6827_s0, 128, %s25_s13, [#allocation3]  }
  0x45   :  { %s6551_s10 = smov [#allocation6]   ;;  %s6552_s12 = smov [#allocation9]  }
  0x46   :  { %s46_s11 = sshll.u32 %s6551_s10, 4  ;;  %s68_s14 = sshll.u32 %s6552_s12, 4  ;;  %s47_s11 = int_to_ptr.vmem [resolvable:$true] %s46_s11  ;;  %s69_s14 = int_to_ptr.vmem [resolvable:$true] %s68_s14 }
  0x47   :  { %s6468_s18 = scalar_lea.hbm %s6829_s2, 256 }
  0x48   :  { %p6469_p4 = scmp.ne.s32.totalorder %s6829_s2, %s6468_s18  ;;  %p6472_p5 = scmp.lt.u32.totalorder %s6468_s18, %s6829_s2 }
  0x4a   :  { %p6474_p6 = pnand %p6472_p5, %p6469_p4 }
  0x4c   :  { %6477 = shalt.err (!%p6474_p6)
}
  0x4d   :  { %s6478_s0 = scalar_lea.vmem %s47_s11, 256  ;;  %p6483_p8 = scmp.lt.s32.totalorder %s47_s11, %s47_s11 }
  0x4e   :  { %p6479_p7 = scmp.ne.s32.totalorder %s47_s11, %s6478_s0  ;;  %p6484_p9 = scmp.lt.s32.totalorder %s6478_s0, %s6478_s0 }
  0x50   :  { %p6485_p10 = por %p6484_p9, %p6483_p8 }
  0x52   :  { %p6486_p11 = pnand %p6485_p10, %p6479_p7 }
  0x54   :  { %6489 = shalt.err (!%p6486_p11)
}
  0x55   :  { %49 = dma.hbm_to_vmem [thread:$0]  %s6829_s2, 256, %s47_s11, [#allocation5]  }
  0x56   :  { %s6490_s25 = scalar_lea.hbm %s6831_s4, 64 }
  0x57   :  { %p6491_p12 = scmp.ne.s32.totalorder %s6831_s4, %s6490_s25  ;;  %p6494_p13 = scmp.lt.u32.totalorder %s6490_s25, %s6831_s4 }
  0x59   :  { %p6496_p0 = pnand %p6494_p13, %p6491_p12 }
  0x5b   :  { %6499 = shalt.err (!%p6496_p0)
}
  0x5c   :  { %s6500_s28 = scalar_lea.vmem %s69_s14, 64  ;;  %p6505_p2 = scmp.lt.s32.totalorder %s69_s14, %s69_s14 }
  0x5d   :  { %p6501_p1 = scmp.ne.s32.totalorder %s69_s14, %s6500_s28  ;;  %p6506_p3 = scmp.lt.s32.totalorder %s6500_s28, %s6500_s28 }
  0x5f   :  { %p6507_p4 = por %p6506_p3, %p6505_p2 }
  0x61   :  { %p6508_p5 = pnand %p6507_p4, %p6501_p1 }
  0x63   :  { %6511 = shalt.err (!%p6508_p5)
}
  0x64   :  { %71 = dma.hbm_to_vmem [thread:$0]  %s6831_s4, 64, %s69_s14, [#allocation8]  }
  0x65   :  { %s6553_s9 = smov [#allocation12]   ;;  %s6512_s11 = scalar_lea.hbm %s6833_s6, 16 }
  0x66   :  { %s90_s5 = sshll.u32 %s6553_s9, 4  ;;  %p6513_p6 = scmp.ne.s32.totalorder %s6833_s6, %s6512_s11  ;;  %s91_s5 = int_to_ptr.vmem [resolvable:$true] %s90_s5 }
  0x67   :  { %p6516_p7 = scmp.lt.u32.totalorder %s6512_s11, %s6833_s6 }
  0x69   :  { %p6518_p8 = pnand %p6516_p7, %p6513_p6 }
  0x6b   :  { %6521 = shalt.err (!%p6518_p8)
}
  0x6c   :  { %s6522_s19 = scalar_lea.vmem %s91_s5, 16  ;;  %s6526_s4 = scalar_lea.vmem %s91_s5, 32 }
  0x6d   :  { %p6523_p9 = scmp.ne.s32.totalorder %s91_s5, %s6522_s19  ;;  %p6527_p10 = scmp.lt.s32.totalorder %s91_s5, %s91_s5 }
  0x6e   :  { %p6528_p11 = scmp.lt.s32.totalorder %s6526_s4, %s6522_s19 }
  0x70   :  { %p6529_p12 = por %p6528_p11, %p6527_p10 }
  0x72   :  { %p6530_p13 = pnand %p6529_p12, %p6523_p9 }
  0x74   :  { %6533 = shalt.err (!%p6530_p13)
}
  0x75   :  { %93 = dma.hbm_to_vmem [thread:$0]  %s6833_s6, 16, %s91_s5, [#allocation11]  }
  0x76   :  { %6534 = dma.done.wait [#allocation3], 128  }
  0x77   :  { %6535 = vsyncadd [#allocation3], 4294967168 }
  0x78   :  { %6536 = dma.done.wait [#allocation5], 4352  }
  0x79   :  { %6537 = vsyncadd [#allocation5], 4294962944 }
  0x7a   :  { %6538 = dma.done.wait [#allocation8], 65600  }
  0x7b   :  { %6539 = vsyncadd [#allocation8], 4294901696 }
  0x7c   :  { %6540 = dma.done.wait [#allocation11], 4112  }
  0x7d   :  { %6541 = vsyncadd [#allocation11], 4294963184  ;;  %v6554_v0 = vmov 0   ;;  %v118_v1 = vld [vmem:[#allocation4] sm:$0xff]  ;;  %v119_v7 = vld [vmem:[#allocation4 + $0x8] sm:$0xff]  ;;  %vm394_vm0 = vcmask 261120  }
  0x7e   :  { %430 = vmatprep.mubr.bf16.mxu0 %v6554_v0  ;;  %471 = vmatprep.mubr.bf16.mxu1 %v6554_v0  ;;  %v126_v2 = vld [vmem:[#allocation4 + $0x40] sm:$0xff]  ;;  %v127_v9 = vld [vmem:[#allocation4 + $0x48] sm:$0xff]  ;;  %v120_v15 = vld [vmem:[#allocation4 + $0x10] sm:$0xff]  ;;  %vm4839_vm1 = vcmask 15360   ;;  %s6555_s6 = smov 127   ;;  %s6556_s0 = smov 1  }
  0x7f   :  { %v134_v3 = vld [vmem:[#allocation4 + $0x80] sm:$0xff]  ;;  %v4871_v4 = vcombine.high %v118_v1, %v126_v2  ;;  %v4870_v5 = vcombine.low %v118_v1, %v126_v2  ;;  %v135_v10 = vld [vmem:[#allocation4 + $0x88] sm:$0xff]  ;;  %v4873_v12 = vcombine.high %v119_v7, %v127_v9  ;;  %v4872_v13 = vcombine.low %v119_v7, %v127_v9  ;;  %v128_v16 = vld [vmem:[#allocation4 + $0x50] sm:$0xff] }
  0x80   :  { %v142_v6 = vld [vmem:[#allocation4 + $0xc0] sm:$0xff]  ;;  %v143_v11 = vld [vmem:[#allocation4 + $0xc8] sm:$0xff]  ;;  %v116_v18 = vld [vmem:[#allocation2] sm:$0xff]  ;;  %v4875_v21 = vcombine.high %v120_v15, %v128_v16  ;;  %v4874_v27 = vcombine.low %v120_v15, %v128_v16  ;;  %vm4855_vm2 = vcmask 7168  }
  0x81   :  { %v4887_v8 = vcombine.high %v134_v3, %v142_v6  ;;  %398 = vmatprep.subr.bf16.mxu0 %v4871_v4  ;;  %v4889_v14 = vcombine.high %v135_v10, %v143_v11  ;;  %v4886_v17 = vcombine.low %v134_v3, %v142_v6  ;;  %v121_v19 = vld [vmem:[#allocation4 + $0x18] sm:$0xff]  ;;  %439 = vmatprep.subr.bf16.mxu1 %v4873_v12  ;;  %v136_v23 = vld [vmem:[#allocation4 + $0x90] sm:$0xff]  ;;  %v122_v32 = vld [vmem:[#allocation4 + $0x20] sm:$0xff] }
  0x82   :  { %399 = vmatpush1.bf16.msra.mxu0 %v4870_v5  ;;  %v129_v20 = vld [vmem:[#allocation4 + $0x58] sm:$0xff]  ;;  %440 = vmatpush1.bf16.msra.mxu1 %v4872_v13  ;;  %v4888_v22 = vcombine.low %v135_v10, %v143_v11  ;;  %v144_v24 = vld [vmem:[#allocation4 + $0xd0] sm:$0xff]  ;;  %v6691_v25 = vpack.c.bf16 %v116_v18, %v116_v18  ;;  %v130_v33 = vld [vmem:[#allocation4 + $0x60] sm:$0xff] }
  0x83   :  { %400 = vmatprep.subr.bf16.mxu0 %v4887_v8  ;;  %441 = vmatprep.subr.bf16.mxu1 %v4889_v14  ;;  %v4877_v26 = vcombine.high %v121_v19, %v129_v20  ;;  %v137_v28 = vld [vmem:[#allocation4 + $0x98] sm:$0xff]  ;;  %v4891_v30 = vcombine.high %v136_v23, %v144_v24  ;;  %v4876_v31 = vcombine.low %v121_v19, %v129_v20  ;;  %v123_v35 = vld [vmem:[#allocation4 + $0x28] sm:$0xff]  ;;  %v138_v40 = vld [vmem:[#allocation4 + $0xa0] sm:$0xff] }
  0x84   :  { %v145_v29 = vld [vmem:[#allocation4 + $0xd8] sm:$0xff]  ;;  %v4890_v36 = vcombine.low %v136_v23, %v144_v24  ;;  %v131_v37 = vld [vmem:[#allocation4 + $0x68] sm:$0xff]  ;;  %v4879_v38 = vcombine.high %v122_v32, %v130_v33  ;;  %v146_v41 = vld [vmem:[#allocation4 + $0xe0] sm:$0xff]  ;;  %v4878_v44 = vcombine.low %v122_v32, %v130_v33 }
  0x85   :  { %v4893_v34 = vcombine.high %v137_v28, %v145_v29  ;;  %v4892_v39 = vcombine.low %v137_v28, %v145_v29  ;;  %v4881_v42 = vcombine.high %v123_v35, %v131_v37  ;;  %v139_v43 = vld [vmem:[#allocation4 + $0xa8] sm:$0xff]  ;;  %v4895_v46 = vcombine.high %v138_v40, %v146_v41  ;;  %v124_v48 = vld [vmem:[#allocation4 + $0x30] sm:$0xff]  ;;  %v125_v51 = vld [vmem:[#allocation4 + $0x38] sm:$0xff] }
  0x86   :  { %401 = vmatpush1.bf16.msra.mxu0 %v4886_v17  ;;  %442 = vmatpush1.bf16.msra.mxu1 %v4888_v22  ;;  %v147_v45 = vld [vmem:[#allocation4 + $0xe8] sm:$0xff]  ;;  %v4880_v47 = vcombine.low %v123_v35, %v131_v37  ;;  %v132_v49 = vld [vmem:[#allocation4 + $0x70] sm:$0xff]  ;;  %v4894_v52 = vcombine.low %v138_v40, %v146_v41  ;;  %v133_v53 = vld [vmem:[#allocation4 + $0x78] sm:$0xff] }
  0x87   :  { %480 = vmatprep.subr.bf16.mxu0 %v4875_v21  ;;  %521 = vmatprep.subr.bf16.mxu1 %v4877_v26  ;;  %v4897_v50 = vcombine.high %v139_v43, %v147_v45  ;;  %v4883_v54 = vcombine.high %v124_v48, %v132_v49  ;;  %v4896_v55 = vcombine.low %v139_v43, %v147_v45  ;;  %v140_v56 = vld [vmem:[#allocation4 + $0xb0] sm:$0xff]  ;;  %v141_v59 = vld [vmem:[#allocation4 + $0xb8] sm:$0xff] }
  0x88   :  { %v148_v57 = vld [vmem:[#allocation4 + $0xf0] sm:$0xff]  ;;  %v4885_v58 = vcombine.high %v125_v51, %v133_v53  ;;  %v4882_v60 = vcombine.low %v124_v48, %v132_v49  ;;  %v149_v61 = vld [vmem:[#allocation4 + $0xf8] sm:$0xff]  ;;  %v4884_v63 = vcombine.low %v125_v51, %v133_v53 }
  0x89   :  { %4902 = vmatmul.mubr.msk.bf16.vlgmr.msra.gmra.mrb[0].mxu0 %vm394_vm0, %v6691_v25  ;;  %4903 = vmatmul.mubr.msk.bf16.vlgmr.msra.gmra.mrb[0].mxu1 %vm394_vm0, %v6691_v25  ;;  %v4899_v62 = vcombine.high %v140_v56, %v148_v57  ;;  %v4901_v1 = vcombine.high %v141_v59, %v149_v61  ;;  %v4898_v2 = vcombine.low %v140_v56, %v148_v57  ;;  %v5576_v3 = vld [vmem:[#allocation7 + $0x4] ss:$16 sps:$4 sm:$0xff]   ;;  %v5579_v5 = vld [vmem:[#allocation7 + $0xc] ss:$16 sps:$4 sm:$0xff]   ;;  %v5574_v6 = vld [vmem:[#allocation7] ss:$16 sps:$4 sm:$0xff]  }
  0x8a   :  { %481 = vmatpush1.bf16.msra.mxu0 %v4874_v27  ;;  %512 = vmatprep.mubr.bf16.mxu0 %v6554_v0  ;;  %v4900_v4 = vcombine.low %v141_v59, %v149_v61  ;;  %v5582_v7 = vld [vmem:[#allocation7 + $0x24] ss:$16 sps:$4 sm:$0xff]   ;;  %v5577_v8 = vld [vmem:[#allocation7 + $0x8] ss:$16 sps:$4 sm:$0xff]   ;;  %v5585_v9 = vld [vmem:[#allocation7 + $0x2c] ss:$16 sps:$4 sm:$0xff]  }
  0x8b   :  { %482 = vmatprep.subr.bf16.mxu0 %v4891_v30  ;;  %522 = vmatpush1.bf16.msra.mxu1 %v4876_v31  ;;  %v5580_v10 = vld [vmem:[#allocation7 + $0x20] ss:$16 sps:$4 sm:$0xff]   ;;  %v5583_v11 = vld [vmem:[#allocation7 + $0x28] ss:$16 sps:$4 sm:$0xff]   ;;  %v5591_v12 = vld [vmem:[#allocation7 + $0x4c] ss:$16 sps:$4 sm:$0xff]  }
  0x8c   :  { %553 = vmatprep.mubr.bf16.mxu1 %v6554_v0  ;;  %523 = vmatprep.subr.bf16.mxu1 %v4893_v34  ;;  %v5586_v13 = vld [vmem:[#allocation7 + $0x40] ss:$16 sps:$4 sm:$0xff]   ;;  %v5594_v14 = vld [vmem:[#allocation7 + $0x64] ss:$16 sps:$4 sm:$0xff]   ;;  %v5589_v15 = vld [vmem:[#allocation7 + $0x48] ss:$16 sps:$4 sm:$0xff]  }
  0x8d   :  { %v5597_v16 = vld [vmem:[#allocation7 + $0x6c] ss:$16 sps:$4 sm:$0xff]   ;;  %v5592_v17 = vld [vmem:[#allocation7 + $0x60] ss:$16 sps:$4 sm:$0xff]   ;;  %v5600_v18 = vld [vmem:[#allocation7 + $0x84] ss:$16 sps:$4 sm:$0xff]  }
  0x8e   :  { %483 = vmatpush1.bf16.msra.mxu0 %v4890_v36  ;;  %v5595_v19 = vld [vmem:[#allocation7 + $0x68] ss:$16 sps:$4 sm:$0xff]   ;;  %v5603_v20 = vld [vmem:[#allocation7 + $0x8c] ss:$16 sps:$4 sm:$0xff]   ;;  %v5598_v21 = vld [vmem:[#allocation7 + $0x80] ss:$16 sps:$4 sm:$0xff]  }
  0x8f   :  { %562 = vmatprep.subr.bf16.mxu0 %v4879_v38  ;;  %524 = vmatpush1.bf16.msra.mxu1 %v4892_v39  ;;  %v5601_v22 = vld [vmem:[#allocation7 + $0x88] ss:$16 sps:$4 sm:$0xff]   ;;  %v5606_v23 = vld [vmem:[#allocation7 + $0xa4] ss:$16 sps:$4 sm:$0xff]   ;;  %v5604_v24 = vld [vmem:[#allocation7 + $0xa0] ss:$16 sps:$4 sm:$0xff]  }
  0x90   :  { %603 = vmatprep.subr.bf16.mxu1 %v4881_v42  ;;  %v5612_v26 = vld [vmem:[#allocation7 + $0xc4] ss:$16 sps:$4 sm:$0xff]   ;;  %v5607_v27 = vld [vmem:[#allocation7 + $0xa8] ss:$16 sps:$4 sm:$0xff]   ;;  %v5615_v28 = vld [vmem:[#allocation7 + $0xcc] ss:$16 sps:$4 sm:$0xff]  }
  0x91   :  { %4904 = vmatmul.mubr.msk.bf16.vlgmr.msra.gmra.mrb[4].mxu0 %vm394_vm0, %v6691_v25  ;;  %v5610_v29 = vld [vmem:[#allocation7 + $0xc0] ss:$16 sps:$4 sm:$0xff]   ;;  %v5618_v30 = vld [vmem:[#allocation7 + $0xe4] ss:$16 sps:$4 sm:$0xff]   ;;  %v5613_v31 = vld [vmem:[#allocation7 + $0xc8] ss:$16 sps:$4 sm:$0xff]  }
  0x92   :  { %563 = vmatpush1.bf16.msra.mxu0 %v4878_v44  ;;  %594 = vmatprep.mubr.bf16.mxu0 %v6554_v0  ;;  %v5621_v32 = vld [vmem:[#allocation7 + $0xec] ss:$16 sps:$4 sm:$0xff]   ;;  %v5616_v33 = vld [vmem:[#allocation7 + $0xe0] ss:$16 sps:$4 sm:$0xff]   ;;  %v5624_v34 = vld [vmem:[#allocation7 + $0x104] ss:$16 sps:$4 sm:$0xff]  }
  0x93   :  { %4905 = vmatmul.mubr.msk.bf16.vlgmr.msra.gmra.mrb[4].mxu1 %vm394_vm0, %v6691_v25  ;;  %564 = vmatprep.subr.bf16.mxu0 %v4895_v46  ;;  %v5619_v35 = vld [vmem:[#allocation7 + $0xe8] ss:$16 sps:$4 sm:$0xff]   ;;  %v5627_v36 = vld [vmem:[#allocation7 + $0x10c] ss:$16 sps:$4 sm:$0xff]   ;;  %v5622_v37 = vld [vmem:[#allocation7 + $0x100] ss:$16 sps:$4 sm:$0xff]  }
  0x94   :  { %604 = vmatpush1.bf16.msra.mxu1 %v4880_v47  ;;  %635 = vmatprep.mubr.bf16.mxu1 %v6554_v0  ;;  %v5630_v38 = vld [vmem:[#allocation7 + $0x124] ss:$16 sps:$4 sm:$0xff]   ;;  %v5625_v39 = vld [vmem:[#allocation7 + $0x108] ss:$16 sps:$4 sm:$0xff]   ;;  %v5633_v40 = vld [vmem:[#allocation7 + $0x12c] ss:$16 sps:$4 sm:$0xff]  }
  0x95   :  { %605 = vmatprep.subr.bf16.mxu1 %v4897_v50  ;;  %v5628_v41 = vld [vmem:[#allocation7 + $0x120] ss:$16 sps:$4 sm:$0xff]   ;;  %v5636_v42 = vld [vmem:[#allocation7 + $0x144] ss:$16 sps:$4 sm:$0xff]   ;;  %v5631_v43 = vld [vmem:[#allocation7 + $0x128] ss:$16 sps:$4 sm:$0xff]  }
  0x96   :  { %565 = vmatpush1.bf16.msra.mxu0 %v4894_v52  ;;  %v5639_v44 = vld [vmem:[#allocation7 + $0x14c] ss:$16 sps:$4 sm:$0xff]   ;;  %v5634_v45 = vld [vmem:[#allocation7 + $0x140] ss:$16 sps:$4 sm:$0xff]   ;;  %v5642_v46 = vld [vmem:[#allocation7 + $0x164] ss:$16 sps:$4 sm:$0xff]  }
  0x97   :  { %644 = vmatprep.subr.bf16.mxu0 %v4883_v54  ;;  %v5637_v47 = vld [vmem:[#allocation7 + $0x148] ss:$16 sps:$4 sm:$0xff]   ;;  %v5645_v48 = vld [vmem:[#allocation7 + $0x16c] ss:$16 sps:$4 sm:$0xff]   ;;  %v5640_v49 = vld [vmem:[#allocation7 + $0x160] ss:$16 sps:$4 sm:$0xff]  }
  0x98   :  { %606 = vmatpush1.bf16.msra.mxu1 %v4896_v55  ;;  %v5648_v50 = vld [vmem:[#allocation7 + $0x184] ss:$16 sps:$4 sm:$0xff]   ;;  %v5643_v51 = vld [vmem:[#allocation7 + $0x168] ss:$16 sps:$4 sm:$0xff]   ;;  %v5651_v52 = vld [vmem:[#allocation7 + $0x18c] ss:$16 sps:$4 sm:$0xff]  }
  0x99   :  { %4906 = vmatmul.mubr.msk.bf16.vlgmr.msra.gmra.mrb[8].mxu0 %vm394_vm0, %v6691_v25  ;;  %685 = vmatprep.subr.bf16.mxu1 %v4885_v58  ;;  %v5646_v53 = vld [vmem:[#allocation7 + $0x180] ss:$16 sps:$4 sm:$0xff]   ;;  %v5654_v54 = vld [vmem:[#allocation7 + $0x1a4] ss:$16 sps:$4 sm:$0xff]   ;;  %v5649_v55 = vld [vmem:[#allocation7 + $0x188] ss:$16 sps:$4 sm:$0xff]  }
  0x9a   :  { %645 = vmatpush1.bf16.msra.mxu0 %v4882_v60  ;;  %676 = vmatprep.mubr.bf16.mxu0 %v6554_v0  ;;  %v5657_v56 = vld [vmem:[#allocation7 + $0x1ac] ss:$16 sps:$4 sm:$0xff]   ;;  %v5652_v57 = vld [vmem:[#allocation7 + $0x1a0] ss:$16 sps:$4 sm:$0xff]   ;;  %v5660_v58 = vld [vmem:[#allocation7 + $0x1c4] ss:$16 sps:$4 sm:$0xff]  }
  0x9b   :  { %4907 = vmatmul.mubr.msk.bf16.vlgmr.msra.gmra.mrb[8].mxu1 %vm394_vm0, %v6691_v25  ;;  %646 = vmatprep.subr.bf16.mxu0 %v4899_v62  ;;  %v5655_v59 = vld [vmem:[#allocation7 + $0x1a8] ss:$16 sps:$4 sm:$0xff]   ;;  %v5663_v60 = vld [vmem:[#allocation7 + $0x1cc] ss:$16 sps:$4 sm:$0xff]   ;;  %v5658_v61 = vld [vmem:[#allocation7 + $0x1c0] ss:$16 sps:$4 sm:$0xff]  }
  0x9c   :  { %686 = vmatpush1.bf16.msra.mxu1 %v4884_v63  ;;  %717 = vmatprep.mubr.bf16.mxu1 %v6554_v0  ;;  %v5588_v0 = vld [vmem:[#allocation7 + $0x44] ss:$16 sps:$4 sm:$0xff]   ;;  %v5661_v62 = vld [vmem:[#allocation7 + $0x1c8] ss:$16 sps:$4 sm:$0xff]  }
  0x9d   :  { %687 = vmatprep.subr.bf16.mxu1 %v4901_v1  ;;  %v5666_v63 = vld [vmem:[#allocation7 + $0x1e4] ss:$16 sps:$4 sm:$0xff]   ;;  %v5669_v1 = vld [vmem:[#allocation7 + $0x1ec] ss:$16 sps:$4 sm:$0xff]  }
  0x9e   :  { %647 = vmatpush1.bf16.msra.mxu0 %v4898_v2  ;;  %v5664_v2 = vld [vmem:[#allocation7 + $0x1e0] ss:$16 sps:$4 sm:$0xff]  }
  0x9f   :  { %3836 = vmatprep.subr.bf16.mxu0 %v5576_v3  ;;  %v5667_v3 = vld [vmem:[#allocation7 + $0x1e8] ss:$16 sps:$4 sm:$0xff]  }
  0xa0   :  { %688 = vmatpush1.bf16.msra.mxu1 %v4900_v4  ;;  %v5672_v4 = vld [vmem:[#allocation7 + $0x204] ss:$16 sps:$4 sm:$0xff]  }
  0xa1   :  { %4908 = vmatmul.mubr.msk.bf16.vlgmr.msra.gmra.mrb[12].mxu0 %vm394_vm0, %v6691_v25  ;;  %4164 = vmatprep.subr.bf16.mxu1 %v5579_v5  ;;  %v5675_v5 = vld [vmem:[#allocation7 + $0x20c] ss:$16 sps:$4 sm:$0xff]  }
  0xa2   :  { %3837 = vmatpush1.bf16.msra.mxu0 %v5574_v6  ;;  %v154_v6 = vlaneseq }
  0xa3   :  { %4909 = vmatmul.mubr.msk.bf16.vlgmr.msra.gmra.mrb[12].mxu1 %vm394_vm0, %v6691_v25  ;;  %3838 = vmatprep.subr.bf16.mxu0 %v5582_v7  ;;  %v5609_v25 = vld [vmem:[#allocation7 + $0xac] ss:$16 sps:$4 sm:$0xff]  }
  0xa4   :  { %4165 = vmatpush1.bf16.msra.mxu1 %v5577_v8  ;;  %v6715_v7 = vshrl.u32 %v154_v6, 7  ;;  %v6717_v8 = vld [vmem:[#allocation6] sm:$0xff]  ;;  %v5705_v6 = vld [vmem:[#allocation7 + $0x2ac] ss:$16 sps:$4 sm:$0xff]  }
  0xa5   :  { %4166 = vmatprep.subr.bf16.mxu1 %v5585_v9 }
  0xa6   :  { %3839 = vmatpush1.bf16.msra.mxu0 %v5580_v10  ;;  %v6720_v9 = vsub.s32 0, %v6715_v7  ;;  %v6723_v10 = vsub.s32 1, %v6715_v7 }
  0xa7   :  { %3840 = vmatprep.subr.bf16.mxu0 %v5588_v0  ;;  %v6726_v0 = vsub.s32 3, %v6715_v7 }
  0xa8   :  { %4167 = vmatpush1.bf16.msra.mxu1 %v5583_v11  ;;  %v157_v11 = vrot.slane %v6717_v8, %v6720_v9 }
  0xa9   :  { %4168 = vmatprep.subr.bf16.mxu1 %v5591_v12  ;;  %v161_v12 = vrot.slane %v6717_v8, %v6723_v10 }
  0xaa   :  { %3841 = vmatpush1.bf16.msra.mxu0 %v5586_v13 }
  0xab   :  { %3842 = vmatprep.subr.bf16.mxu0 %v5594_v14  ;;  %v169_v14 = vrot.slane %v6717_v8, %v6726_v0 }
  0xac   :  { %4169 = vmatpush1.bf16.msra.mxu1 %v5589_v15 }
  0xad   :  { %4170 = vmatprep.subr.bf16.mxu1 %v5597_v16 }
  0xae   :  { %3843 = vmatpush1.bf16.msra.mxu0 %v5592_v17 }
  0xaf   :  { %3844 = vmatprep.subr.bf16.mxu0 %v5600_v18 }
  0xb0   :  { %4171 = vmatpush1.bf16.msra.mxu1 %v5595_v19  ;;  %v5670_v19 = vld [vmem:[#allocation7 + $0x200] ss:$16 sps:$4 sm:$0xff]  }
  0xb1   :  { %4172 = vmatprep.subr.bf16.mxu1 %v5603_v20  ;;  %v5673_v20 = vld [vmem:[#allocation7 + $0x208] ss:$16 sps:$4 sm:$0xff]  }
  0xb2   :  { %3845 = vmatpush1.bf16.msra.mxu0 %v5598_v21 }
  0xb3   :  { %3846 = vmatprep.subr.bf16.mxu0 %v5606_v23 }
  0xb4   :  { %4173 = vmatpush1.bf16.msra.mxu1 %v5601_v22 }
  0xb5   :  { %4174 = vmatprep.subr.bf16.mxu1 %v5609_v25 }
  0xb6   :  { %3847 = vmatpush1.bf16.msra.mxu0 %v5604_v24 }
  0xb7   :  { %3848 = vmatprep.subr.bf16.mxu0 %v5612_v26 }
  0xb8   :  { %4175 = vmatpush1.bf16.msra.mxu1 %v5607_v27 }
  0xb9   :  { %4176 = vmatprep.subr.bf16.mxu1 %v5615_v28  ;;  %v5678_v28 = vld [vmem:[#allocation7 + $0x224] ss:$16 sps:$4 sm:$0xff]  }
  0xba   :  { %3849 = vmatpush1.bf16.msra.mxu0 %v5610_v29  ;;  %v5681_v29 = vld [vmem:[#allocation7 + $0x22c] ss:$16 sps:$4 sm:$0xff]  }
  0xbb   :  { %3850 = vmatprep.subr.bf16.mxu0 %v5618_v30 }
  0xbc   :  { %4177 = vmatpush1.bf16.msra.mxu1 %v5613_v31 }
  0xbd   :  { %4178 = vmatprep.subr.bf16.mxu1 %v5621_v32  ;;  %v5676_v32 = vld [vmem:[#allocation7 + $0x220] ss:$16 sps:$4 sm:$0xff]  }
  0xbe   :  { %3851 = vmatpush1.bf16.msra.mxu0 %v5616_v33  ;;  %v5679_v33 = vld [vmem:[#allocation7 + $0x228] ss:$16 sps:$4 sm:$0xff]  }
  0xbf   :  { %3852 = vmatprep.subr.bf16.mxu0 %v5624_v34 }
  0xc0   :  { %4179 = vmatpush1.bf16.msra.mxu1 %v5619_v35  ;;  %v5684_v35 = vld [vmem:[#allocation7 + $0x244] ss:$16 sps:$4 sm:$0xff]  }
  0xc1   :  { %4180 = vmatprep.subr.bf16.mxu1 %v5627_v36  ;;  %v5687_v36 = vld [vmem:[#allocation7 + $0x24c] ss:$16 sps:$4 sm:$0xff]  }
  0xc2   :  { %3853 = vmatpush1.bf16.msra.mxu0 %v5622_v37 }
  0xc3   :  { %3854 = vmatprep.subr.bf16.mxu0 %v5630_v38 }
  0xc4   :  { %4181 = vmatpush1.bf16.msra.mxu1 %v5625_v39 }
  0xc5   :  { %4182 = vmatprep.subr.bf16.mxu1 %v5633_v40 }
  0xc6   :  { %3855 = vmatpush1.bf16.msra.mxu0 %v5628_v41 }
  0xc7   :  { %3856 = vmatprep.subr.bf16.mxu0 %v5636_v42  ;;  %v5682_v42 = vld [vmem:[#allocation7 + $0x240] ss:$16 sps:$4 sm:$0xff]  }
  0xc8   :  { %4183 = vmatpush1.bf16.msra.mxu1 %v5631_v43  ;;  %v5685_v43 = vld [vmem:[#allocation7 + $0x248] ss:$16 sps:$4 sm:$0xff]  }
  0xc9   :  { %4184 = vmatprep.subr.bf16.mxu1 %v5639_v44 }
  0xca   :  { %3857 = vmatpush1.bf16.msra.mxu0 %v5634_v45  ;;  %v5690_v45 = vld [vmem:[#allocation7 + $0x264] ss:$16 sps:$4 sm:$0xff]  }
  0xcb   :  { %3858 = vmatprep.subr.bf16.mxu0 %v5642_v46  ;;  %v5693_v46 = vld [vmem:[#allocation7 + $0x26c] ss:$16 sps:$4 sm:$0xff]  }
  0xcc   :  { %4185 = vmatpush1.bf16.msra.mxu1 %v5637_v47 }
  0xcd   :  { %4186 = vmatprep.subr.bf16.mxu1 %v5645_v48  ;;  %v151_v48 = vld [vmem:[#allocation6 + $0x8] sm:$0xff] }
  0xce   :  { %3859 = vmatpush1.bf16.msra.mxu0 %v5640_v49  ;;  %v6745_v49 = vsub.s32 2, %v6715_v7 }
  0xcf   :  { %3860 = vmatprep.subr.bf16.mxu0 %v5648_v50  ;;  %v5688_v50 = vld [vmem:[#allocation7 + $0x260] ss:$16 sps:$4 sm:$0xff]  }
  0xd0   :  { %4187 = vmatpush1.bf16.msra.mxu1 %v5643_v51  ;;  %v5691_v51 = vld [vmem:[#allocation7 + $0x268] ss:$16 sps:$4 sm:$0xff]  }
  0xd1   :  { %4188 = vmatprep.subr.bf16.mxu1 %v5651_v52 }
  0xd2   :  { %3861 = vmatpush1.bf16.msra.mxu0 %v5646_v53  ;;  %v197_v53 = vrot.slane %v151_v48, %v6745_v49 }
  0xd3   :  { %3862 = vmatprep.subr.bf16.mxu0 %v5654_v54  ;;  %v201_v54 = vrot.slane %v151_v48, %v6726_v0 }
  0xd4   :  { %4189 = vmatpush1.bf16.msra.mxu1 %v5649_v55  ;;  %v5696_v55 = vld [vmem:[#allocation7 + $0x284] ss:$16 sps:$4 sm:$0xff]  }
  0xd5   :  { %4190 = vmatprep.subr.bf16.mxu1 %v5657_v56  ;;  %v5699_v56 = vld [vmem:[#allocation7 + $0x28c] ss:$16 sps:$4 sm:$0xff]  }
  0xd6   :  { %3863 = vmatpush1.bf16.msra.mxu0 %v5652_v57 }
  0xd7   :  { %3864 = vmatprep.subr.bf16.mxu0 %v5660_v58 }
  0xd8   :  { %4191 = vmatpush1.bf16.msra.mxu1 %v5655_v59 }
  0xd9   :  { %4192 = vmatprep.subr.bf16.mxu1 %v5663_v60  ;;  %v172_v60 = vsub.s32 4, %v6715_v7 }
  0xda   :  { %3865 = vmatpush1.bf16.msra.mxu0 %v5658_v61 }
  0xdb   :  { %3866 = vmatprep.subr.bf16.mxu0 %v5666_v63 }
  0xdc   :  { %4193 = vmatpush1.bf16.msra.mxu1 %v5661_v62 }
  0xdd   :  { %4194 = vmatprep.subr.bf16.mxu1 %v5669_v1  ;;  %v5694_v1 = vld [vmem:[#allocation7 + $0x280] ss:$16 sps:$4 sm:$0xff]  }
  0xde   :  { %3867 = vmatpush1.bf16.msra.mxu0 %v5664_v2  ;;  %v5697_v2 = vld [vmem:[#allocation7 + $0x288] ss:$16 sps:$4 sm:$0xff]  }
  0xdf   :  { %3877 = vmatprep.subr.bf16.mxu0 %v5672_v4 }
  0xe0   :  { %4195 = vmatpush1.bf16.msra.mxu1 %v5667_v3 }
  0xe1   :  { %4205 = vmatprep.subr.bf16.mxu1 %v5675_v5  ;;  %v5702_v5 = vld [vmem:[#allocation7 + $0x2a4] ss:$16 sps:$4 sm:$0xff]  }
 0x15c   :  { %v432_v13 = vpop.f32.mrb[0].mxu0  ;;  %v6734_v21 = vpop.f32.mrb[0].mxu1 }
 0x15d   :  { %v433_v15 = vadd.f32 %v432_v13, %v157_v11  ;;  %v434_v16 = vpop.f32.mrb[1].mxu0  ;;  %v475_v23 = vpop.f32.mrb[1].mxu1  ;;  %v176_v13 = vsub.s32 5, %v6715_v7 }
 0x15e   :  { %v435_v17 = vadd.f32 %v434_v16, %v161_v12  ;;  %v436_v18 = vpop.f32.mrb[2].mxu0  ;;  %v476_v25 = vadd.f32 %v475_v23, %v169_v14  ;;  %v477_v26 = vpop.f32.mrb[2].mxu1  ;;  %v205_v12 = vrot.slane %v151_v48, %v172_v60  ;;  %v180_v14 = vsub.s32 6, %v6715_v7  ;;  %v5700_v16 = vld [vmem:[#allocation7 + $0x2a0] ss:$16 sps:$4 sm:$0xff]  }
 0x15f   :  { %v437_v22 = vpop.f32.mrb[3].mxu0  ;;  %v726_v27 = vpack.c.bf16 %v433_v15, %v433_v15  ;;  %v478_v30 = vpop.f32.mrb[3].mxu1  ;;  %v184_v15 = vsub.s32 7, %v6715_v7  ;;  %v5708_v23 = vld [vmem:[#allocation7 + $0x2c4] ss:$16 sps:$4 sm:$0xff]  }
 0x160   :  { %v727_v24 = vpack.c.bf16 %v435_v17, %v435_v17  ;;  %v729_v31 = vpack.c.bf16 %v476_v25, %v476_v25  ;;  %v5703_v17 = vld [vmem:[#allocation7 + $0x2a8] ss:$16 sps:$4 sm:$0xff]   ;;  %v5963_v7 = vld [vmem:[#allocation7 + $0x80c] ss:$16 sps:$4 sm:$0xff]  }
 0x161   :  { %v217_v22 = vrot.slane %v151_v48, %v184_v15 }
 0x162   :  { %3868 = vmatprep.mubr.bf16.mxu0 %v727_v24  ;;  %4196 = vmatprep.mubr.bf16.mxu1 %v727_v24  ;;  %v5711_v24 = vld [vmem:[#allocation7 + $0x2cc] ss:$16 sps:$4 sm:$0xff]  }
 0x163   :  { %3869 = vmatmul.mubr.bf16.vlgmr.msra.gmra.mrb[16].mxu0 %v726_v27  ;;  %4197 = vmatmul.mubr.bf16.vlgmr.msra.gmra.mrb[16].mxu1 %v726_v27 }
 0x164   :  { %3878 = vmatpush1.bf16.msra.mxu0 %v5670_v19  ;;  %4206 = vmatpush1.bf16.msra.mxu1 %v5673_v20  ;;  %v6736_v34 = vpop.f32.mrb[4].mxu0  ;;  %v209_v19 = vrot.slane %v151_v48, %v176_v13  ;;  %v213_v20 = vrot.slane %v151_v48, %v180_v14  ;;  %v5718_v48 = vld [vmem:[#allocation7 + $0x300] ss:$16 sps:$4 sm:$0xff]  }
 0x165   :  { %3879 = vmatprep.subr.bf16.mxu0 %v5678_v28  ;;  %4207 = vmatprep.subr.bf16.mxu1 %v5681_v29  ;;  %v6738_v37 = vpop.f32.mrb[5].mxu0 }
 0x166   :  { %3909 = vmatprep.mubr.bf16.mxu0 %v729_v31  ;;  %4237 = vmatprep.mubr.bf16.mxu1 %v729_v31  ;;  %v518_v38 = vpop.f32.mrb[6].mxu0  ;;  %v6740_v39 = vpop.f32.mrb[4].mxu1 }
 0x167   :  { %v519_v40 = vpop.f32.mrb[7].mxu0  ;;  %v6742_v41 = vpop.f32.mrb[5].mxu1 }
 0x168   :  { %3880 = vmatpush1.bf16.msra.mxu0 %v5676_v32  ;;  %4208 = vmatpush1.bf16.msra.mxu1 %v5679_v33  ;;  %v559_v44 = vpop.f32.mrb[6].mxu1  ;;  %v5706_v33 = vld [vmem:[#allocation7 + $0x2c0] ss:$16 sps:$4 sm:$0xff]   ;;  %v5714_v40 = vld [vmem:[#allocation7 + $0x2e4] ss:$16 sps:$4 sm:$0xff]  }
 0x169   :  { %3881 = vmatprep.subr.bf16.mxu0 %v5684_v35  ;;  %4209 = vmatprep.subr.bf16.mxu1 %v5687_v36  ;;  %v560_v47 = vpop.f32.mrb[7].mxu1  ;;  %v5709_v35 = vld [vmem:[#allocation7 + $0x2c8] ss:$16 sps:$4 sm:$0xff]   ;;  %v5712_v44 = vld [vmem:[#allocation7 + $0x2e0] ss:$16 sps:$4 sm:$0xff]  }
 0x16a   :  { %v5723_v47 = vld [vmem:[#allocation7 + $0x30c] ss:$16 sps:$4 sm:$0xff]  }
 0x16c   :  { %3882 = vmatpush1.bf16.msra.mxu0 %v5682_v42  ;;  %4210 = vmatpush1.bf16.msra.mxu1 %v5685_v43  ;;  %v6747_v52 = vpop.f32.mrb[8].mxu0  ;;  %v5717_v42 = vld [vmem:[#allocation7 + $0x2ec] ss:$16 sps:$4 sm:$0xff]  }
 0x16d   :  { %3883 = vmatprep.subr.bf16.mxu0 %v5690_v45  ;;  %4211 = vmatprep.subr.bf16.mxu1 %v5693_v46  ;;  %v6751_v57 = vpop.f32.mrb[9].mxu0  ;;  %v5715_v45 = vld [vmem:[#allocation7 + $0x2e8] ss:$16 sps:$4 sm:$0xff]   ;;  %v5720_v46 = vld [vmem:[#allocation7 + $0x304] ss:$16 sps:$4 sm:$0xff]  }
 0x16e   :  { %v600_v58 = vpop.f32.mrb[10].mxu0  ;;  %v637_v59 = vpop.f32.mrb[8].mxu1 }
 0x16f   :  { %v6754_v61 = vadd.f32 %v637_v59, %v197_v53  ;;  %v601_v62 = vpop.f32.mrb[11].mxu0  ;;  %v639_v63 = vpop.f32.mrb[9].mxu1  ;;  %v5729_v53 = vld [vmem:[#allocation7 + $0x32c] ss:$16 sps:$4 sm:$0xff]   ;;  %v5730_v59 = vld [vmem:[#allocation7 + $0x340] ss:$16 sps:$4 sm:$0xff]  }
 0x170   :  { %3884 = vmatpush1.bf16.msra.mxu0 %v5688_v50  ;;  %4212 = vmatpush1.bf16.msra.mxu1 %v5691_v51  ;;  %v6756_v3 = vadd.f32 %v639_v63, %v201_v54  ;;  %v641_v4 = vpop.f32.mrb[10].mxu1  ;;  %v5721_v50 = vld [vmem:[#allocation7 + $0x308] ss:$16 sps:$4 sm:$0xff]   ;;  %v5726_v51 = vld [vmem:[#allocation7 + $0x324] ss:$16 sps:$4 sm:$0xff]  }
 0x171   :  { %3885 = vmatprep.subr.bf16.mxu0 %v5696_v55  ;;  %4213 = vmatprep.subr.bf16.mxu1 %v5699_v56  ;;  %v642_v11 = vpop.f32.mrb[11].mxu1  ;;  %v5724_v54 = vld [vmem:[#allocation7 + $0x320] ss:$16 sps:$4 sm:$0xff]   ;;  %v5727_v55 = vld [vmem:[#allocation7 + $0x328] ss:$16 sps:$4 sm:$0xff]  }
 0x172   :  { %v5732_v56 = vld [vmem:[#allocation7 + $0x344] ss:$16 sps:$4 sm:$0xff]   ;;  %v5735_v58 = vld [vmem:[#allocation7 + $0x34c] ss:$16 sps:$4 sm:$0xff]   ;;  %v5733_v62 = vld [vmem:[#allocation7 + $0x348] ss:$16 sps:$4 sm:$0xff]  }
 0x173   :  { %v5738_v63 = vld [vmem:[#allocation7 + $0x364] ss:$16 sps:$4 sm:$0xff]   ;;  %v5739_v4 = vld [vmem:[#allocation7 + $0x368] ss:$16 sps:$4 sm:$0xff]   ;;  %v5742_v11 = vld [vmem:[#allocation7 + $0x380] ss:$16 sps:$4 sm:$0xff]  }
 0x174   :  { %3886 = vmatpush1.bf16.msra.mxu0 %v5694_v1  ;;  %4214 = vmatpush1.bf16.msra.mxu1 %v5697_v2  ;;  %v678_v18 = vpop.f32.mrb[12].mxu0  ;;  %v5741_v1 = vld [vmem:[#allocation7 + $0x36c] ss:$16 sps:$4 sm:$0xff]   ;;  %v5736_v2 = vld [vmem:[#allocation7 + $0x360] ss:$16 sps:$4 sm:$0xff]  }
 0x175   :  { %3887 = vmatprep.subr.bf16.mxu0 %v5702_v5  ;;  %4215 = vmatprep.subr.bf16.mxu1 %v5705_v6  ;;  %v6769_v25 = vadd.f32 %v678_v18, %v205_v12  ;;  %v680_v26 = vpop.f32.mrb[13].mxu0  ;;  %v5744_v5 = vld [vmem:[#allocation7 + $0x384] ss:$16 sps:$4 sm:$0xff]   ;;  %v5747_v6 = vld [vmem:[#allocation7 + $0x38c] ss:$16 sps:$4 sm:$0xff]  }
 0x176   :  { %v6771_v27 = vadd.f32 %v680_v26, %v209_v19  ;;  %v682_v28 = vpop.f32.mrb[14].mxu0  ;;  %v719_v29 = vpop.f32.mrb[12].mxu1  ;;  %v5745_v12 = vld [vmem:[#allocation7 + $0x388] ss:$16 sps:$4 sm:$0xff]   ;;  %v5748_v18 = vld [vmem:[#allocation7 + $0x3a0] ss:$16 sps:$4 sm:$0xff]  }
 0x177   :  { %v6773_v30 = vadd.f32 %v719_v29, %v213_v20  ;;  %v683_v31 = vpop.f32.mrb[15].mxu0  ;;  %v721_v32 = vpop.f32.mrb[13].mxu1  ;;  %v5751_v19 = vld [vmem:[#allocation7 + $0x3a8] ss:$16 sps:$4 sm:$0xff]   ;;  %v5756_v20 = vld [vmem:[#allocation7 + $0x3c4] ss:$16 sps:$4 sm:$0xff]  }
 0x178   :  { %3888 = vmatpush1.bf16.msra.mxu0 %v5700_v16  ;;  %4216 = vmatpush1.bf16.msra.mxu1 %v5703_v17  ;;  %v6775_v36 = vadd.f32 %v721_v32, %v217_v22  ;;  %v723_v38 = vpop.f32.mrb[14].mxu1  ;;  %v5750_v16 = vld [vmem:[#allocation7 + $0x3a4] ss:$16 sps:$4 sm:$0xff]   ;;  %v5753_v17 = vld [vmem:[#allocation7 + $0x3ac] ss:$16 sps:$4 sm:$0xff]   ;;  %v177_v31 = vrot.slane %v6717_v8, %v176_v13 }
 0x179   :  { %3889 = vmatprep.subr.bf16.mxu0 %v5708_v23  ;;  %4217 = vmatprep.subr.bf16.mxu1 %v5711_v24  ;;  %v724_v43 = vpop.f32.mrb[15].mxu1  ;;  %v5759_v22 = vld [vmem:[#allocation7 + $0x3cc] ss:$16 sps:$4 sm:$0xff]   ;;  %v165_v23 = vrot.slane %v6717_v8, %v6745_v49  ;;  %v5754_v24 = vld [vmem:[#allocation7 + $0x3c0] ss:$16 sps:$4 sm:$0xff]  }
 0x17a   :  { %v5757_v26 = vld [vmem:[#allocation7 + $0x3c8] ss:$16 sps:$4 sm:$0xff]   ;;  %v5762_v28 = vld [vmem:[#allocation7 + $0x3e4] ss:$16 sps:$4 sm:$0xff]   ;;  %v5765_v29 = vld [vmem:[#allocation7 + $0x3ec] ss:$16 sps:$4 sm:$0xff]  }
 0x17b   :  { %v474_v32 = vadd.f32 %v6734_v21, %v165_v23  ;;  %v5768_v38 = vld [vmem:[#allocation7 + $0x404] ss:$16 sps:$4 sm:$0xff]  }
 0x17c   :  { %3890 = vmatpush1.bf16.msra.mxu0 %v5706_v33  ;;  %4218 = vmatpush1.bf16.msra.mxu1 %v5709_v35  ;;  %v5760_v33 = vld [vmem:[#allocation7 + $0x3e0] ss:$16 sps:$4 sm:$0xff]   ;;  %v5763_v35 = vld [vmem:[#allocation7 + $0x3e8] ss:$16 sps:$4 sm:$0xff]   ;;  %v5774_v13 = vld [vmem:[#allocation7 + $0x424] ss:$16 sps:$4 sm:$0xff]  }
 0x17d   :  { %3891 = vmatprep.subr.bf16.mxu0 %v5714_v40  ;;  %4219 = vmatprep.subr.bf16.mxu1 %v5717_v42  ;;  %v5771_v40 = vld [vmem:[#allocation7 + $0x40c] ss:$16 sps:$4 sm:$0xff]   ;;  %v517_v42 = vadd.f32 %v6738_v37, %v177_v31  ;;  %v728_v43 = vpack.c.bf16 %v474_v32, %v474_v32  ;;  %v5816_v23 = vld [vmem:[#allocation7 + $0x504] ss:$16 sps:$4 sm:$0xff]   ;;  %v5820_v32 = vld [vmem:[#allocation7 + $0x520] ss:$16 sps:$4 sm:$0xff]  }
 0x17e   :  { %v5783_v37 = vld [vmem:[#allocation7 + $0x44c] ss:$16 sps:$4 sm:$0xff]  }
 0x17f   :  { %v731_v21 = vpack.c.bf16 %v517_v42, %v517_v42  ;;  %v5825_v31 = vld [vmem:[#allocation7 + $0x52c] ss:$16 sps:$4 sm:$0xff]   ;;  %v5829_v42 = vld [vmem:[#allocation7 + $0x548] ss:$16 sps:$4 sm:$0xff]  }
 0x180   :  { %3892 = vmatpush1.bf16.msra.mxu0 %v5712_v44  ;;  %4220 = vmatpush1.bf16.msra.mxu1 %v5715_v45  ;;  %v5766_v44 = vld [vmem:[#allocation7 + $0x400] ss:$16 sps:$4 sm:$0xff]   ;;  %v5769_v45 = vld [vmem:[#allocation7 + $0x408] ss:$16 sps:$4 sm:$0xff]  }
 0x181   :  { %3893 = vmatprep.subr.bf16.mxu0 %v5720_v46  ;;  %4221 = vmatprep.subr.bf16.mxu1 %v5723_v47  ;;  %v5777_v46 = vld [vmem:[#allocation7 + $0x42c] ss:$16 sps:$4 sm:$0xff]   ;;  %v5772_v47 = vld [vmem:[#allocation7 + $0x420] ss:$16 sps:$4 sm:$0xff]  }
 0x184   :  { %3894 = vmatpush1.bf16.msra.mxu0 %v5718_v48  ;;  %4222 = vmatpush1.bf16.msra.mxu1 %v5721_v50  ;;  %v5775_v48 = vld [vmem:[#allocation7 + $0x428] ss:$16 sps:$4 sm:$0xff]   ;;  %v5780_v50 = vld [vmem:[#allocation7 + $0x444] ss:$16 sps:$4 sm:$0xff]  }
 0x185   :  { %3895 = vmatprep.subr.bf16.mxu0 %v5726_v51  ;;  %4223 = vmatprep.subr.bf16.mxu1 %v5729_v53  ;;  %v5778_v51 = vld [vmem:[#allocation7 + $0x440] ss:$16 sps:$4 sm:$0xff]   ;;  %v5781_v53 = vld [vmem:[#allocation7 + $0x448] ss:$16 sps:$4 sm:$0xff]  }
 0x188   :  { %3896 = vmatpush1.bf16.msra.mxu0 %v5724_v54  ;;  %4224 = vmatpush1.bf16.msra.mxu1 %v5727_v55  ;;  %v5786_v54 = vld [vmem:[#allocation7 + $0x464] ss:$16 sps:$4 sm:$0xff]   ;;  %v5789_v55 = vld [vmem:[#allocation7 + $0x46c] ss:$16 sps:$4 sm:$0xff]  }
 0x189   :  { %3897 = vmatprep.subr.bf16.mxu0 %v5732_v56  ;;  %4225 = vmatprep.subr.bf16.mxu1 %v5735_v58  ;;  %v5784_v56 = vld [vmem:[#allocation7 + $0x460] ss:$16 sps:$4 sm:$0xff]   ;;  %v5787_v58 = vld [vmem:[#allocation7 + $0x468] ss:$16 sps:$4 sm:$0xff]  }
 0x18c   :  { %3898 = vmatpush1.bf16.msra.mxu0 %v5730_v59  ;;  %4226 = vmatpush1.bf16.msra.mxu1 %v5733_v62  ;;  %v5792_v59 = vld [vmem:[#allocation7 + $0x484] ss:$16 sps:$4 sm:$0xff]   ;;  %v5795_v62 = vld [vmem:[#allocation7 + $0x48c] ss:$16 sps:$4 sm:$0xff]  }
 0x18d   :  { %3899 = vmatprep.subr.bf16.mxu0 %v5738_v63  ;;  %4227 = vmatprep.subr.bf16.mxu1 %v5741_v1  ;;  %v5790_v63 = vld [vmem:[#allocation7 + $0x480] ss:$16 sps:$4 sm:$0xff]   ;;  %v5793_v1 = vld [vmem:[#allocation7 + $0x488] ss:$16 sps:$4 sm:$0xff]  }
 0x190   :  { %3900 = vmatpush1.bf16.msra.mxu0 %v5736_v2  ;;  %4228 = vmatpush1.bf16.msra.mxu1 %v5739_v4  ;;  %v5798_v2 = vld [vmem:[#allocation7 + $0x4a4] ss:$16 sps:$4 sm:$0xff]   ;;  %v5801_v4 = vld [vmem:[#allocation7 + $0x4ac] ss:$16 sps:$4 sm:$0xff]  }
 0x191   :  { %3901 = vmatprep.subr.bf16.mxu0 %v5744_v5  ;;  %4229 = vmatprep.subr.bf16.mxu1 %v5747_v6  ;;  %v5796_v5 = vld [vmem:[#allocation7 + $0x4a0] ss:$16 sps:$4 sm:$0xff]   ;;  %v5799_v6 = vld [vmem:[#allocation7 + $0x4a8] ss:$16 sps:$4 sm:$0xff]  }
 0x194   :  { %3902 = vmatpush1.bf16.msra.mxu0 %v5742_v11  ;;  %4230 = vmatpush1.bf16.msra.mxu1 %v5745_v12  ;;  %v5804_v11 = vld [vmem:[#allocation7 + $0x4c4] ss:$16 sps:$4 sm:$0xff]   ;;  %v5807_v12 = vld [vmem:[#allocation7 + $0x4cc] ss:$16 sps:$4 sm:$0xff]  }
 0x195   :  { %3903 = vmatprep.subr.bf16.mxu0 %v5750_v16  ;;  %4231 = vmatprep.subr.bf16.mxu1 %v5753_v17  ;;  %v5802_v16 = vld [vmem:[#allocation7 + $0x4c0] ss:$16 sps:$4 sm:$0xff]   ;;  %v5805_v17 = vld [vmem:[#allocation7 + $0x4c8] ss:$16 sps:$4 sm:$0xff]  }
 0x198   :  { %3904 = vmatpush1.bf16.msra.mxu0 %v5748_v18  ;;  %4232 = vmatpush1.bf16.msra.mxu1 %v5751_v19  ;;  %v5810_v18 = vld [vmem:[#allocation7 + $0x4e4] ss:$16 sps:$4 sm:$0xff]   ;;  %v5813_v19 = vld [vmem:[#allocation7 + $0x4ec] ss:$16 sps:$4 sm:$0xff]  }
 0x199   :  { %3905 = vmatprep.subr.bf16.mxu0 %v5756_v20  ;;  %4233 = vmatprep.subr.bf16.mxu1 %v5759_v22  ;;  %v5808_v20 = vld [vmem:[#allocation7 + $0x4e0] ss:$16 sps:$4 sm:$0xff]   ;;  %v5811_v22 = vld [vmem:[#allocation7 + $0x4e8] ss:$16 sps:$4 sm:$0xff]  }
 0x19c   :  { %3906 = vmatpush1.bf16.msra.mxu0 %v5754_v24  ;;  %4234 = vmatpush1.bf16.msra.mxu1 %v5757_v26  ;;  %v5819_v24 = vld [vmem:[#allocation7 + $0x50c] ss:$16 sps:$4 sm:$0xff]   ;;  %v5814_v26 = vld [vmem:[#allocation7 + $0x500] ss:$16 sps:$4 sm:$0xff]  }
 0x19d   :  { %3907 = vmatprep.subr.bf16.mxu0 %v5762_v28  ;;  %4235 = vmatprep.subr.bf16.mxu1 %v5765_v29  ;;  %v5817_v28 = vld [vmem:[#allocation7 + $0x508] ss:$16 sps:$4 sm:$0xff]   ;;  %v5822_v29 = vld [vmem:[#allocation7 + $0x524] ss:$16 sps:$4 sm:$0xff]  }
 0x1a0   :  { %3908 = vmatpush1.bf16.msra.mxu0 %v5760_v33  ;;  %4236 = vmatpush1.bf16.msra.mxu1 %v5763_v35  ;;  %v5823_v33 = vld [vmem:[#allocation7 + $0x528] ss:$16 sps:$4 sm:$0xff]   ;;  %v5828_v35 = vld [vmem:[#allocation7 + $0x544] ss:$16 sps:$4 sm:$0xff]  }
 0x1a1   :  { %3918 = vmatprep.subr.bf16.mxu0 %v5768_v38  ;;  %4246 = vmatprep.subr.bf16.mxu1 %v5771_v40  ;;  %v5831_v38 = vld [vmem:[#allocation7 + $0x54c] ss:$16 sps:$4 sm:$0xff]   ;;  %v5826_v40 = vld [vmem:[#allocation7 + $0x540] ss:$16 sps:$4 sm:$0xff]  }
 0x1a3   :  { %3910 = vmatmul.mubr.bf16.vlgmr.msra.gmra.mrb[16].mxu0 %v728_v43  ;;  %4238 = vmatmul.mubr.bf16.vlgmr.msra.gmra.mrb[16].mxu1 %v728_v43  ;;  %v5834_v43 = vld [vmem:[#allocation7 + $0x564] ss:$16 sps:$4 sm:$0xff]  }
 0x1a4   :  { %3919 = vmatpush1.bf16.msra.mxu0 %v5766_v44  ;;  %4247 = vmatpush1.bf16.msra.mxu1 %v5769_v45  ;;  %v5837_v44 = vld [vmem:[#allocation7 + $0x56c] ss:$16 sps:$4 sm:$0xff]   ;;  %v5832_v45 = vld [vmem:[#allocation7 + $0x560] ss:$16 sps:$4 sm:$0xff]  }
 0x1a5   :  { %3920 = vmatprep.subr.bf16.mxu0 %v5774_v13  ;;  %4248 = vmatprep.subr.bf16.mxu1 %v5777_v46  ;;  %v5835_v13 = vld [vmem:[#allocation7 + $0x568] ss:$16 sps:$4 sm:$0xff]   ;;  %v5840_v46 = vld [vmem:[#allocation7 + $0x584] ss:$16 sps:$4 sm:$0xff]  }
 0x1a6   :  { %3950 = vmatprep.mubr.bf16.mxu0 %v731_v21  ;;  %4278 = vmatprep.mubr.bf16.mxu1 %v731_v21  ;;  %v5843_v21 = vld [vmem:[#allocation7 + $0x58c] ss:$16 sps:$4 sm:$0xff]  }
 0x1a8   :  { %3921 = vmatpush1.bf16.msra.mxu0 %v5772_v47  ;;  %4249 = vmatpush1.bf16.msra.mxu1 %v5775_v48  ;;  %v5838_v47 = vld [vmem:[#allocation7 + $0x580] ss:$16 sps:$4 sm:$0xff]   ;;  %v5841_v48 = vld [vmem:[#allocation7 + $0x588] ss:$16 sps:$4 sm:$0xff]  }
 0x1a9   :  { %3922 = vmatprep.subr.bf16.mxu0 %v5780_v50  ;;  %4250 = vmatprep.subr.bf16.mxu1 %v5783_v37  ;;  %v5846_v50 = vld [vmem:[#allocation7 + $0x5a4] ss:$16 sps:$4 sm:$0xff]   ;;  %v5849_v37 = vld [vmem:[#allocation7 + $0x5ac] ss:$16 sps:$4 sm:$0xff]  }
 0x1ac   :  { %3923 = vmatpush1.bf16.msra.mxu0 %v5778_v51  ;;  %4251 = vmatpush1.bf16.msra.mxu1 %v5781_v53  ;;  %v5844_v51 = vld [vmem:[#allocation7 + $0x5a0] ss:$16 sps:$4 sm:$0xff]   ;;  %v5847_v53 = vld [vmem:[#allocation7 + $0x5a8] ss:$16 sps:$4 sm:$0xff]  }
 0x1ad   :  { %3924 = vmatprep.subr.bf16.mxu0 %v5786_v54  ;;  %4252 = vmatprep.subr.bf16.mxu1 %v5789_v55  ;;  %v5852_v54 = vld [vmem:[#allocation7 + $0x5c4] ss:$16 sps:$4 sm:$0xff]   ;;  %v5855_v55 = vld [vmem:[#allocation7 + $0x5cc] ss:$16 sps:$4 sm:$0xff]  }
 0x1b0   :  { %3925 = vmatpush1.bf16.msra.mxu0 %v5784_v56  ;;  %4253 = vmatpush1.bf16.msra.mxu1 %v5787_v58  ;;  %v173_v56 = vrot.slane %v6717_v8, %v172_v60  ;;  %v5850_v58 = vld [vmem:[#allocation7 + $0x5c0] ss:$16 sps:$4 sm:$0xff]   ;;  %v5864_v60 = vld [vmem:[#allocation7 + $0x604] ss:$16 sps:$4 sm:$0xff]  }
 0x1b1   :  { %3926 = vmatprep.subr.bf16.mxu0 %v5792_v59  ;;  %4254 = vmatprep.subr.bf16.mxu1 %v5795_v62  ;;  %v5853_v59 = vld [vmem:[#allocation7 + $0x5c8] ss:$16 sps:$4 sm:$0xff]   ;;  %v5858_v62 = vld [vmem:[#allocation7 + $0x5e4] ss:$16 sps:$4 sm:$0xff]  }
 0x1b4   :  { %3927 = vmatpush1.bf16.msra.mxu0 %v5790_v63  ;;  %4255 = vmatpush1.bf16.msra.mxu1 %v5793_v1  ;;  %v5861_v63 = vld [vmem:[#allocation7 + $0x5ec] ss:$16 sps:$4 sm:$0xff]   ;;  %v185_v1 = vrot.slane %v6717_v8, %v184_v15  ;;  %v5870_v8 = vld [vmem:[#allocation7 + $0x624] ss:$16 sps:$4 sm:$0xff]  }
 0x1b5   :  { %3928 = vmatprep.subr.bf16.mxu0 %v5798_v2  ;;  %4256 = vmatprep.subr.bf16.mxu1 %v5801_v4  ;;  %v515_v2 = vadd.f32 %v6736_v34, %v173_v56  ;;  %v5856_v4 = vld [vmem:[#allocation7 + $0x5e0] ss:$16 sps:$4 sm:$0xff]   ;;  %v5873_v15 = vld [vmem:[#allocation7 + $0x62c] ss:$16 sps:$4 sm:$0xff]  }
 0x1b6   :  { %v5921_v56 = vld [vmem:[#allocation7 + $0x72c] ss:$16 sps:$4 sm:$0xff]  }
 0x1b8   :  { %3929 = vmatpush1.bf16.msra.mxu0 %v5796_v5  ;;  %4257 = vmatpush1.bf16.msra.mxu1 %v5799_v6  ;;  %v5859_v5 = vld [vmem:[#allocation7 + $0x5e8] ss:$16 sps:$4 sm:$0xff]   ;;  %v5867_v6 = vld [vmem:[#allocation7 + $0x60c] ss:$16 sps:$4 sm:$0xff]  }
 0x1b9   :  { %3930 = vmatprep.subr.bf16.mxu0 %v5804_v11  ;;  %4258 = vmatprep.subr.bf16.mxu1 %v5807_v12  ;;  %v558_v11 = vadd.f32 %v6742_v41, %v185_v1  ;;  %v730_v12 = vpack.c.bf16 %v515_v2, %v515_v2  ;;  %v5879_v41 = vld [vmem:[#allocation7 + $0x64c] ss:$16 sps:$4 sm:$0xff]   ;;  %v5922_v1 = vld [vmem:[#allocation7 + $0x740] ss:$16 sps:$4 sm:$0xff]   ;;  %v5925_v2 = vld [vmem:[#allocation7 + $0x748] ss:$16 sps:$4 sm:$0xff]  }
 0x1bb   :  { %v733_v34 = vpack.c.bf16 %v558_v11, %v558_v11  ;;  %v5936_v11 = vld [vmem:[#allocation7 + $0x784] ss:$16 sps:$4 sm:$0xff]  }
 0x1bc   :  { %3931 = vmatpush1.bf16.msra.mxu0 %v5802_v16  ;;  %4259 = vmatpush1.bf16.msra.mxu1 %v5805_v17  ;;  %v5862_v16 = vld [vmem:[#allocation7 + $0x600] ss:$16 sps:$4 sm:$0xff]   ;;  %v5865_v17 = vld [vmem:[#allocation7 + $0x608] ss:$16 sps:$4 sm:$0xff]  }
 0x1bd   :  { %3932 = vmatprep.subr.bf16.mxu0 %v5810_v18  ;;  %4260 = vmatprep.subr.bf16.mxu1 %v5813_v19  ;;  %v5868_v18 = vld [vmem:[#allocation7 + $0x620] ss:$16 sps:$4 sm:$0xff]   ;;  %v5871_v19 = vld [vmem:[#allocation7 + $0x628] ss:$16 sps:$4 sm:$0xff]  }
 0x1c0   :  { %3933 = vmatpush1.bf16.msra.mxu0 %v5808_v20  ;;  %4261 = vmatpush1.bf16.msra.mxu1 %v5811_v22  ;;  %v5876_v20 = vld [vmem:[#allocation7 + $0x644] ss:$16 sps:$4 sm:$0xff]   ;;  %v5874_v22 = vld [vmem:[#allocation7 + $0x640] ss:$16 sps:$4 sm:$0xff]  }
 0x1c1   :  { %3934 = vmatprep.subr.bf16.mxu0 %v5816_v23  ;;  %4262 = vmatprep.subr.bf16.mxu1 %v5819_v24  ;;  %v5877_v23 = vld [vmem:[#allocation7 + $0x648] ss:$16 sps:$4 sm:$0xff]   ;;  %v5882_v24 = vld [vmem:[#allocation7 + $0x664] ss:$16 sps:$4 sm:$0xff]  }
 0x1c4   :  { %3935 = vmatpush1.bf16.msra.mxu0 %v5814_v26  ;;  %4263 = vmatpush1.bf16.msra.mxu1 %v5817_v28  ;;  %v5885_v26 = vld [vmem:[#allocation7 + $0x66c] ss:$16 sps:$4 sm:$0xff]   ;;  %v5880_v28 = vld [vmem:[#allocation7 + $0x660] ss:$16 sps:$4 sm:$0xff]  }
 0x1c5   :  { %3936 = vmatprep.subr.bf16.mxu0 %v5822_v29  ;;  %4264 = vmatprep.subr.bf16.mxu1 %v5825_v31  ;;  %v5883_v29 = vld [vmem:[#allocation7 + $0x668] ss:$16 sps:$4 sm:$0xff]   ;;  %v5888_v31 = vld [vmem:[#allocation7 + $0x684] ss:$16 sps:$4 sm:$0xff]  }
 0x1c8   :  { %3937 = vmatpush1.bf16.msra.mxu0 %v5820_v32  ;;  %4265 = vmatpush1.bf16.msra.mxu1 %v5823_v33  ;;  %v5891_v32 = vld [vmem:[#allocation7 + $0x68c] ss:$16 sps:$4 sm:$0xff]   ;;  %v5886_v33 = vld [vmem:[#allocation7 + $0x680] ss:$16 sps:$4 sm:$0xff]  }
 0x1c9   :  { %3938 = vmatprep.subr.bf16.mxu0 %v5828_v35  ;;  %4266 = vmatprep.subr.bf16.mxu1 %v5831_v38  ;;  %v5889_v35 = vld [vmem:[#allocation7 + $0x688] ss:$16 sps:$4 sm:$0xff]   ;;  %v5894_v38 = vld [vmem:[#allocation7 + $0x6a4] ss:$16 sps:$4 sm:$0xff]  }
 0x1cc   :  { %3939 = vmatpush1.bf16.msra.mxu0 %v5826_v40  ;;  %4267 = vmatpush1.bf16.msra.mxu1 %v5829_v42  ;;  %v5897_v40 = vld [vmem:[#allocation7 + $0x6ac] ss:$16 sps:$4 sm:$0xff]   ;;  %v5892_v42 = vld [vmem:[#allocation7 + $0x6a0] ss:$16 sps:$4 sm:$0xff]  }
 0x1cd   :  { %3940 = vmatprep.subr.bf16.mxu0 %v5834_v43  ;;  %4268 = vmatprep.subr.bf16.mxu1 %v5837_v44  ;;  %v5895_v43 = vld [vmem:[#allocation7 + $0x6a8] ss:$16 sps:$4 sm:$0xff]   ;;  %v5900_v44 = vld [vmem:[#allocation7 + $0x6c4] ss:$16 sps:$4 sm:$0xff]  }
 0x1d0   :  { %3941 = vmatpush1.bf16.msra.mxu0 %v5832_v45  ;;  %4269 = vmatpush1.bf16.msra.mxu1 %v5835_v13  ;;  %v5903_v45 = vld [vmem:[#allocation7 + $0x6cc] ss:$16 sps:$4 sm:$0xff]   ;;  %v5898_v13 = vld [vmem:[#allocation7 + $0x6c0] ss:$16 sps:$4 sm:$0xff]  }
 0x1d1   :  { %3942 = vmatprep.subr.bf16.mxu0 %v5840_v46  ;;  %4270 = vmatprep.subr.bf16.mxu1 %v5843_v21  ;;  %v5901_v46 = vld [vmem:[#allocation7 + $0x6c8] ss:$16 sps:$4 sm:$0xff]   ;;  %v5906_v21 = vld [vmem:[#allocation7 + $0x6e4] ss:$16 sps:$4 sm:$0xff]  }
 0x1d4   :  { %3943 = vmatpush1.bf16.msra.mxu0 %v5838_v47  ;;  %4271 = vmatpush1.bf16.msra.mxu1 %v5841_v48  ;;  %v5909_v47 = vld [vmem:[#allocation7 + $0x6ec] ss:$16 sps:$4 sm:$0xff]   ;;  %v5904_v48 = vld [vmem:[#allocation7 + $0x6e0] ss:$16 sps:$4 sm:$0xff]  }
 0x1d5   :  { %3944 = vmatprep.subr.bf16.mxu0 %v5846_v50  ;;  %4272 = vmatprep.subr.bf16.mxu1 %v5849_v37  ;;  %v5907_v50 = vld [vmem:[#allocation7 + $0x6e8] ss:$16 sps:$4 sm:$0xff]   ;;  %v5912_v37 = vld [vmem:[#allocation7 + $0x704] ss:$16 sps:$4 sm:$0xff]  }
 0x1d8   :  { %3945 = vmatpush1.bf16.msra.mxu0 %v5844_v51  ;;  %4273 = vmatpush1.bf16.msra.mxu1 %v5847_v53  ;;  %v5915_v51 = vld [vmem:[#allocation7 + $0x70c] ss:$16 sps:$4 sm:$0xff]   ;;  %v5910_v53 = vld [vmem:[#allocation7 + $0x700] ss:$16 sps:$4 sm:$0xff]  }
 0x1d9   :  { %3946 = vmatprep.subr.bf16.mxu0 %v5852_v54  ;;  %4274 = vmatprep.subr.bf16.mxu1 %v5855_v55  ;;  %v5913_v54 = vld [vmem:[#allocation7 + $0x708] ss:$16 sps:$4 sm:$0xff]   ;;  %v5918_v55 = vld [vmem:[#allocation7 + $0x724] ss:$16 sps:$4 sm:$0xff]  }
 0x1dc   :  { %3947 = vmatpush1.bf16.msra.mxu0 %v5850_v58  ;;  %4275 = vmatpush1.bf16.msra.mxu1 %v5853_v59  ;;  %v5916_v58 = vld [vmem:[#allocation7 + $0x720] ss:$16 sps:$4 sm:$0xff]   ;;  %v5919_v59 = vld [vmem:[#allocation7 + $0x728] ss:$16 sps:$4 sm:$0xff]  }
 0x1dd   :  { %3948 = vmatprep.subr.bf16.mxu0 %v5858_v62  ;;  %4276 = vmatprep.subr.bf16.mxu1 %v5861_v63  ;;  %v5924_v62 = vld [vmem:[#allocation7 + $0x744] ss:$16 sps:$4 sm:$0xff]   ;;  %v5927_v63 = vld [vmem:[#allocation7 + $0x74c] ss:$16 sps:$4 sm:$0xff]  }
 0x1e0   :  { %3949 = vmatpush1.bf16.msra.mxu0 %v5856_v4  ;;  %4277 = vmatpush1.bf16.msra.mxu1 %v5859_v5  ;;  %v5930_v4 = vld [vmem:[#allocation7 + $0x764] ss:$16 sps:$4 sm:$0xff]   ;;  %v5933_v5 = vld [vmem:[#allocation7 + $0x76c] ss:$16 sps:$4 sm:$0xff]  }
 0x1e1   :  { %3959 = vmatprep.subr.bf16.mxu0 %v5864_v60  ;;  %4287 = vmatprep.subr.bf16.mxu1 %v5867_v6  ;;  %v5928_v60 = vld [vmem:[#allocation7 + $0x760] ss:$16 sps:$4 sm:$0xff]   ;;  %v5931_v6 = vld [vmem:[#allocation7 + $0x768] ss:$16 sps:$4 sm:$0xff]  }
 0x1e3   :  { %3951 = vmatmul.mubr.bf16.vlgmr.msra.gmra.mrb[16].mxu0 %v730_v12  ;;  %4279 = vmatmul.mubr.bf16.vlgmr.msra.gmra.mrb[16].mxu1 %v730_v12  ;;  %v5939_v12 = vld [vmem:[#allocation7 + $0x78c] ss:$16 sps:$4 sm:$0xff]  }
 0x1e4   :  { %3960 = vmatpush1.bf16.msra.mxu0 %v5862_v16  ;;  %4288 = vmatpush1.bf16.msra.mxu1 %v5865_v17  ;;  %v5934_v16 = vld [vmem:[#allocation7 + $0x780] ss:$16 sps:$4 sm:$0xff]   ;;  %v5937_v17 = vld [vmem:[#allocation7 + $0x788] ss:$16 sps:$4 sm:$0xff]  }
 0x1e5   :  { %3961 = vmatprep.subr.bf16.mxu0 %v5870_v8  ;;  %4289 = vmatprep.subr.bf16.mxu1 %v5873_v15  ;;  %v5942_v8 = vld [vmem:[#allocation7 + $0x7a4] ss:$16 sps:$4 sm:$0xff]   ;;  %v5945_v15 = vld [vmem:[#allocation7 + $0x7ac] ss:$16 sps:$4 sm:$0xff]  }
 0x1e6   :  { %3991 = vmatprep.mubr.bf16.mxu0 %v733_v34  ;;  %4319 = vmatprep.mubr.bf16.mxu1 %v733_v34  ;;  %v5940_v34 = vld [vmem:[#allocation7 + $0x7a0] ss:$16 sps:$4 sm:$0xff]  }
 0x1e8   :  { %3962 = vmatpush1.bf16.msra.mxu0 %v5868_v18  ;;  %4290 = vmatpush1.bf16.msra.mxu1 %v5871_v19  ;;  %v5943_v18 = vld [vmem:[#allocation7 + $0x7a8] ss:$16 sps:$4 sm:$0xff]   ;;  %v5948_v19 = vld [vmem:[#allocation7 + $0x7c4] ss:$16 sps:$4 sm:$0xff]  }
 0x1e9   :  { %3963 = vmatprep.subr.bf16.mxu0 %v5876_v20  ;;  %4291 = vmatprep.subr.bf16.mxu1 %v5879_v41  ;;  %v5951_v20 = vld [vmem:[#allocation7 + $0x7cc] ss:$16 sps:$4 sm:$0xff]   ;;  %v5946_v41 = vld [vmem:[#allocation7 + $0x7c0] ss:$16 sps:$4 sm:$0xff]  }
 0x1ec   :  { %3964 = vmatpush1.bf16.msra.mxu0 %v5874_v22  ;;  %4292 = vmatpush1.bf16.msra.mxu1 %v5877_v23  ;;  %v5949_v22 = vld [vmem:[#allocation7 + $0x7c8] ss:$16 sps:$4 sm:$0xff]   ;;  %v6378_v23 = vld [vmem:[#allocation6] sm:$0xff] }
 0x1ed   :  { %3965 = vmatprep.subr.bf16.mxu0 %v5882_v24  ;;  %4293 = vmatprep.subr.bf16.mxu1 %v5885_v26  ;;  %v181_v24 = vrot.slane %v6378_v23, %v180_v14  ;;  %v5954_v26 = vld [vmem:[#allocation7 + $0x7e4] ss:$16 sps:$4 sm:$0xff]   ;;  %v6023_v23 = vld [vmem:[#allocation7 + $0x94c] ss:$16 sps:$4 sm:$0xff]  }
 0x1f0   :  { %3966 = vmatpush1.bf16.msra.mxu0 %v5880_v28  ;;  %4294 = vmatpush1.bf16.msra.mxu1 %v5883_v29  ;;  %v5957_v28 = vld [vmem:[#allocation7 + $0x7ec] ss:$16 sps:$4 sm:$0xff]  }
 0x1f1   :  { %3967 = vmatprep.subr.bf16.mxu0 %v5888_v31  ;;  %4295 = vmatprep.subr.bf16.mxu1 %v5891_v32  ;;  %v6794_v29 = vld [vmem:[#allocation6 + $0x8] sm:$0xff]  ;;  %v5952_v32 = vld [vmem:[#allocation7 + $0x7e0] ss:$16 sps:$4 sm:$0xff]  }
 0x1f2   :  { %v193_v31 = vrot.slane %v6794_v29, %v6723_v10 }
 0x1f4   :  { %3968 = vmatpush1.bf16.msra.mxu0 %v5886_v33  ;;  %4296 = vmatpush1.bf16.msra.mxu1 %v5889_v35  ;;  %v5955_v33 = vld [vmem:[#allocation7 + $0x7e8] ss:$16 sps:$4 sm:$0xff]   ;;  %v556_v35 = vadd.f32 %v6740_v39, %v181_v24  ;;  %v599_v14 = vadd.f32 %v6751_v57, %v193_v31  ;;  %v5964_v39 = vld [vmem:[#allocation7 + $0x820] ss:$16 sps:$4 sm:$0xff]   ;;  %v5975_v57 = vld [vmem:[#allocation7 + $0x84c] ss:$16 sps:$4 sm:$0xff]  }
 0x1f5   :  { %3969 = vmatprep.subr.bf16.mxu0 %v5894_v38  ;;  %4297 = vmatprep.subr.bf16.mxu1 %v5897_v40  ;;  %v5960_v38 = vld [vmem:[#allocation7 + $0x804] ss:$16 sps:$4 sm:$0xff]   ;;  %v5958_v40 = vld [vmem:[#allocation7 + $0x800] ss:$16 sps:$4 sm:$0xff]   ;;  %v6029_v31 = vld [vmem:[#allocation7 + $0x96c] ss:$16 sps:$4 sm:$0xff]  }
 0x1f6   :  { %v6018_v24 = vld [vmem:[#allocation7 + $0x940] ss:$16 sps:$4 sm:$0xff]  }
 0x1f8   :  { %3970 = vmatpush1.bf16.msra.mxu0 %v5892_v42  ;;  %4298 = vmatpush1.bf16.msra.mxu1 %v5895_v43  ;;  %v732_v42 = vpack.c.bf16 %v556_v35, %v556_v35  ;;  %v5961_v43 = vld [vmem:[#allocation7 + $0x808] ss:$16 sps:$4 sm:$0xff]   ;;  %v6032_v35 = vld [vmem:[#allocation7 + $0x984] ss:$16 sps:$4 sm:$0xff]  }
 0x1f9   :  { %3971 = vmatprep.subr.bf16.mxu0 %v5900_v44  ;;  %4299 = vmatprep.subr.bf16.mxu1 %v5903_v45  ;;  %v735_v44 = vpack.c.bf16 %v599_v14, %v599_v14  ;;  %v5966_v45 = vld [vmem:[#allocation7 + $0x824] ss:$16 sps:$4 sm:$0xff]   ;;  %v6033_v14 = vld [vmem:[#allocation7 + $0x988] ss:$16 sps:$4 sm:$0xff]  }
 0x1fc   :  { %3972 = vmatpush1.bf16.msra.mxu0 %v5898_v13  ;;  %4300 = vmatpush1.bf16.msra.mxu1 %v5901_v46  ;;  %v5969_v13 = vld [vmem:[#allocation7 + $0x82c] ss:$16 sps:$4 sm:$0xff]   ;;  %v5967_v46 = vld [vmem:[#allocation7 + $0x828] ss:$16 sps:$4 sm:$0xff]  }
 0x1fd   :  { %3973 = vmatprep.subr.bf16.mxu0 %v5906_v21  ;;  %4301 = vmatprep.subr.bf16.mxu1 %v5909_v47  ;;  %v5972_v21 = vld [vmem:[#allocation7 + $0x844] ss:$16 sps:$4 sm:$0xff]   ;;  %v5970_v47 = vld [vmem:[#allocation7 + $0x840] ss:$16 sps:$4 sm:$0xff]  }
 0x200   :  { %3974 = vmatpush1.bf16.msra.mxu0 %v5904_v48  ;;  %4302 = vmatpush1.bf16.msra.mxu1 %v5907_v50  ;;  %v5973_v48 = vld [vmem:[#allocation7 + $0x848] ss:$16 sps:$4 sm:$0xff]   ;;  %v5978_v50 = vld [vmem:[#allocation7 + $0x864] ss:$16 sps:$4 sm:$0xff]  }
 0x201   :  { %3975 = vmatprep.subr.bf16.mxu0 %v5912_v37  ;;  %4303 = vmatprep.subr.bf16.mxu1 %v5915_v51  ;;  %v5981_v37 = vld [vmem:[#allocation7 + $0x86c] ss:$16 sps:$4 sm:$0xff]   ;;  %v5976_v51 = vld [vmem:[#allocation7 + $0x860] ss:$16 sps:$4 sm:$0xff]  }
 0x204   :  { %3976 = vmatpush1.bf16.msra.mxu0 %v5910_v53  ;;  %4304 = vmatpush1.bf16.msra.mxu1 %v5913_v54  ;;  %v5979_v53 = vld [vmem:[#allocation7 + $0x868] ss:$16 sps:$4 sm:$0xff]   ;;  %v5984_v54 = vld [vmem:[#allocation7 + $0x884] ss:$16 sps:$4 sm:$0xff]  }
 0x205   :  { %3977 = vmatprep.subr.bf16.mxu0 %v5918_v55  ;;  %4305 = vmatprep.subr.bf16.mxu1 %v5921_v56  ;;  %v5987_v55 = vld [vmem:[#allocation7 + $0x88c] ss:$16 sps:$4 sm:$0xff]   ;;  %v5982_v56 = vld [vmem:[#allocation7 + $0x880] ss:$16 sps:$4 sm:$0xff]  }
 0x208   :  { %3978 = vmatpush1.bf16.msra.mxu0 %v5916_v58  ;;  %4306 = vmatpush1.bf16.msra.mxu1 %v5919_v59  ;;  %v5985_v58 = vld [vmem:[#allocation7 + $0x888] ss:$16 sps:$4 sm:$0xff]   ;;  %v5990_v59 = vld [vmem:[#allocation7 + $0x8a4] ss:$16 sps:$4 sm:$0xff]  }
 0x209   :  { %3979 = vmatprep.subr.bf16.mxu0 %v5924_v62  ;;  %4307 = vmatprep.subr.bf16.mxu1 %v5927_v63  ;;  %v5993_v62 = vld [vmem:[#allocation7 + $0x8ac] ss:$16 sps:$4 sm:$0xff]   ;;  %v5988_v63 = vld [vmem:[#allocation7 + $0x8a0] ss:$16 sps:$4 sm:$0xff]  }
 0x20c   :  { %3980 = vmatpush1.bf16.msra.mxu0 %v5922_v1  ;;  %4308 = vmatpush1.bf16.msra.mxu1 %v5925_v2  ;;  %v5991_v1 = vld [vmem:[#allocation7 + $0x8a8] ss:$16 sps:$4 sm:$0xff]   ;;  %v5996_v2 = vld [vmem:[#allocation7 + $0x8c4] ss:$16 sps:$4 sm:$0xff]  }
 0x20d   :  { %3981 = vmatprep.subr.bf16.mxu0 %v5930_v4  ;;  %4309 = vmatprep.subr.bf16.mxu1 %v5933_v5  ;;  %v5999_v4 = vld [vmem:[#allocation7 + $0x8cc] ss:$16 sps:$4 sm:$0xff]   ;;  %v5994_v5 = vld [vmem:[#allocation7 + $0x8c0] ss:$16 sps:$4 sm:$0xff]  }
 0x210   :  { %3982 = vmatpush1.bf16.msra.mxu0 %v5928_v60  ;;  %4310 = vmatpush1.bf16.msra.mxu1 %v5931_v6  ;;  %v5997_v60 = vld [vmem:[#allocation7 + $0x8c8] ss:$16 sps:$4 sm:$0xff]   ;;  %v6002_v6 = vld [vmem:[#allocation7 + $0x8e4] ss:$16 sps:$4 sm:$0xff]  }
 0x211   :  { %3983 = vmatprep.subr.bf16.mxu0 %v5936_v11  ;;  %4311 = vmatprep.subr.bf16.mxu1 %v5939_v12  ;;  %v6005_v11 = vld [vmem:[#allocation7 + $0x8ec] ss:$16 sps:$4 sm:$0xff]   ;;  %v6000_v12 = vld [vmem:[#allocation7 + $0x8e0] ss:$16 sps:$4 sm:$0xff]  }
 0x214   :  { %3984 = vmatpush1.bf16.msra.mxu0 %v5934_v16  ;;  %4312 = vmatpush1.bf16.msra.mxu1 %v5937_v17  ;;  %v6003_v16 = vld [vmem:[#allocation7 + $0x8e8] ss:$16 sps:$4 sm:$0xff]   ;;  %v6008_v17 = vld [vmem:[#allocation7 + $0x904] ss:$16 sps:$4 sm:$0xff]  }
 0x215   :  { %3985 = vmatprep.subr.bf16.mxu0 %v5942_v8  ;;  %4313 = vmatprep.subr.bf16.mxu1 %v5945_v15  ;;  %v6011_v8 = vld [vmem:[#allocation7 + $0x90c] ss:$16 sps:$4 sm:$0xff]   ;;  %v6006_v15 = vld [vmem:[#allocation7 + $0x900] ss:$16 sps:$4 sm:$0xff]  }
 0x218   :  { %3986 = vmatpush1.bf16.msra.mxu0 %v5940_v34  ;;  %4314 = vmatpush1.bf16.msra.mxu1 %v5943_v18  ;;  %v6009_v34 = vld [vmem:[#allocation7 + $0x908] ss:$16 sps:$4 sm:$0xff]   ;;  %v6014_v18 = vld [vmem:[#allocation7 + $0x924] ss:$16 sps:$4 sm:$0xff]  }
 0x219   :  { %3987 = vmatprep.subr.bf16.mxu0 %v5948_v19  ;;  %4315 = vmatprep.subr.bf16.mxu1 %v5951_v20  ;;  %v6017_v19 = vld [vmem:[#allocation7 + $0x92c] ss:$16 sps:$4 sm:$0xff]   ;;  %v6012_v20 = vld [vmem:[#allocation7 + $0x920] ss:$16 sps:$4 sm:$0xff]  }
 0x21c   :  { %3988 = vmatpush1.bf16.msra.mxu0 %v5946_v41  ;;  %4316 = vmatpush1.bf16.msra.mxu1 %v5949_v22  ;;  %v6015_v41 = vld [vmem:[#allocation7 + $0x928] ss:$16 sps:$4 sm:$0xff]   ;;  %v6020_v22 = vld [vmem:[#allocation7 + $0x944] ss:$16 sps:$4 sm:$0xff]  }
 0x21d   :  { %3989 = vmatprep.subr.bf16.mxu0 %v5954_v26  ;;  %4317 = vmatprep.subr.bf16.mxu1 %v5957_v28  ;;  %v6021_v26 = vld [vmem:[#allocation7 + $0x948] ss:$16 sps:$4 sm:$0xff]   ;;  %v6026_v28 = vld [vmem:[#allocation7 + $0x964] ss:$16 sps:$4 sm:$0xff]  }
 0x220   :  { %3990 = vmatpush1.bf16.msra.mxu0 %v5952_v32  ;;  %4318 = vmatpush1.bf16.msra.mxu1 %v5955_v33  ;;  %v6024_v32 = vld [vmem:[#allocation7 + $0x960] ss:$16 sps:$4 sm:$0xff]   ;;  %v6027_v33 = vld [vmem:[#allocation7 + $0x968] ss:$16 sps:$4 sm:$0xff]  }
 0x221   :  { %4000 = vmatprep.subr.bf16.mxu0 %v5960_v38  ;;  %4328 = vmatprep.subr.bf16.mxu1 %v5963_v7  ;;  %v6035_v38 = vld [vmem:[#allocation7 + $0x98c] ss:$16 sps:$4 sm:$0xff]   ;;  %v6030_v7 = vld [vmem:[#allocation7 + $0x980] ss:$16 sps:$4 sm:$0xff]  }
 0x223   :  { %3992 = vmatmul.mubr.bf16.vlgmr.msra.gmra.mrb[16].mxu0 %v732_v42  ;;  %4320 = vmatmul.mubr.bf16.vlgmr.msra.gmra.mrb[16].mxu1 %v732_v42  ;;  %v6041_v42 = vld [vmem:[#allocation7 + $0x9ac] ss:$16 sps:$4 sm:$0xff]  }
 0x224   :  { %4001 = vmatpush1.bf16.msra.mxu0 %v5958_v40  ;;  %4032 = vmatprep.mubr.bf16.mxu0 %v735_v44  ;;  %v6038_v40 = vld [vmem:[#allocation7 + $0x9a4] ss:$16 sps:$4 sm:$0xff]  }
 0x225   :  { %4329 = vmatpush1.bf16.msra.mxu1 %v5961_v43  ;;  %4360 = vmatprep.mubr.bf16.mxu1 %v735_v44  ;;  %v6036_v43 = vld [vmem:[#allocation7 + $0x9a0] ss:$16 sps:$4 sm:$0xff]   ;;  %v6039_v44 = vld [vmem:[#allocation7 + $0x9a8] ss:$16 sps:$4 sm:$0xff]  }
 0x226   :  { %4002 = vmatprep.subr.bf16.mxu0 %v5966_v45  ;;  %4330 = vmatprep.subr.bf16.mxu1 %v5969_v13  ;;  %v6044_v45 = vld [vmem:[#allocation7 + $0x9c4] ss:$16 sps:$4 sm:$0xff]   ;;  %v6047_v13 = vld [vmem:[#allocation7 + $0x9cc] ss:$16 sps:$4 sm:$0xff]  }
 0x228   :  { %4003 = vmatpush1.bf16.msra.mxu0 %v5964_v39  ;;  %v6042_v39 = vld [vmem:[#allocation7 + $0x9c0] ss:$16 sps:$4 sm:$0xff]  }
 0x229   :  { %4331 = vmatpush1.bf16.msra.mxu1 %v5967_v46  ;;  %4004 = vmatprep.subr.bf16.mxu0 %v5972_v21  ;;  %v189_v46 = vrot.slane %v6794_v29, %v6720_v9  ;;  %v6045_v21 = vld [vmem:[#allocation7 + $0x9c8] ss:$16 sps:$4 sm:$0xff]  }
 0x22a   :  { %4332 = vmatprep.subr.bf16.mxu1 %v5975_v57  ;;  %v6050_v57 = vld [vmem:[#allocation7 + $0x9e4] ss:$16 sps:$4 sm:$0xff]   ;;  %v6057_v29 = vld [vmem:[#allocation7 + $0xa08] ss:$16 sps:$4 sm:$0xff]  }
 0x22c   :  { %4005 = vmatpush1.bf16.msra.mxu0 %v5970_v47  ;;  %v6053_v47 = vld [vmem:[#allocation7 + $0x9ec] ss:$16 sps:$4 sm:$0xff]  }
 0x22d   :  { %4333 = vmatpush1.bf16.msra.mxu1 %v5973_v48  ;;  %4006 = vmatprep.subr.bf16.mxu0 %v5978_v50  ;;  %v6048_v48 = vld [vmem:[#allocation7 + $0x9e0] ss:$16 sps:$4 sm:$0xff]   ;;  %v597_v50 = vadd.f32 %v6747_v52, %v189_v46 }
 0x22e   :  { %4334 = vmatprep.subr.bf16.mxu1 %v5981_v37  ;;  %v6051_v37 = vld [vmem:[#allocation7 + $0x9e8] ss:$16 sps:$4 sm:$0xff]   ;;  %v6060_v52 = vld [vmem:[#allocation7 + $0xa20] ss:$16 sps:$4 sm:$0xff]  }
 0x22f   :  { %v6120_v46 = vld [vmem:[#allocation7 + $0xb60] ss:$16 sps:$4 sm:$0xff]  }
 0x230   :  { %4007 = vmatpush1.bf16.msra.mxu0 %v5976_v51  ;;  %v6056_v51 = vld [vmem:[#allocation7 + $0xa04] ss:$16 sps:$4 sm:$0xff]  }
 0x231   :  { %4335 = vmatpush1.bf16.msra.mxu1 %v5979_v53  ;;  %4008 = vmatprep.subr.bf16.mxu0 %v5984_v54  ;;  %v6059_v53 = vld [vmem:[#allocation7 + $0xa0c] ss:$16 sps:$4 sm:$0xff]   ;;  %v6054_v54 = vld [vmem:[#allocation7 + $0xa00] ss:$16 sps:$4 sm:$0xff]  }
 0x232   :  { %4336 = vmatprep.subr.bf16.mxu1 %v5987_v55  ;;  %v734_v55 = vpack.c.bf16 %v597_v50, %v597_v50  ;;  %v6129_v50 = vld [vmem:[#allocation7 + $0xb88] ss:$16 sps:$4 sm:$0xff]  }
 0x234   :  { %4009 = vmatpush1.bf16.msra.mxu0 %v5982_v56  ;;  %v6062_v56 = vld [vmem:[#allocation7 + $0xa24] ss:$16 sps:$4 sm:$0xff]  }
 0x235   :  { %4337 = vmatpush1.bf16.msra.mxu1 %v5985_v58  ;;  %4010 = vmatprep.subr.bf16.mxu0 %v5990_v59  ;;  %v737_v58 = vpack.c.bf16 %v6756_v3, %v6756_v3  ;;  %v6065_v59 = vld [vmem:[#allocation7 + $0xa2c] ss:$16 sps:$4 sm:$0xff]  }
 0x236   :  { %4338 = vmatprep.subr.bf16.mxu1 %v5993_v62  ;;  %v6063_v62 = vld [vmem:[#allocation7 + $0xa28] ss:$16 sps:$4 sm:$0xff]   ;;  %v6077_v3 = vld [vmem:[#allocation7 + $0xa6c] ss:$16 sps:$4 sm:$0xff]  }
 0x238   :  { %4011 = vmatpush1.bf16.msra.mxu0 %v5988_v63  ;;  %v6068_v63 = vld [vmem:[#allocation7 + $0xa44] ss:$16 sps:$4 sm:$0xff]  }
 0x239   :  { %4339 = vmatpush1.bf16.msra.mxu1 %v5991_v1  ;;  %4012 = vmatprep.subr.bf16.mxu0 %v5996_v2  ;;  %v6071_v1 = vld [vmem:[#allocation7 + $0xa4c] ss:$16 sps:$4 sm:$0xff]   ;;  %v6066_v2 = vld [vmem:[#allocation7 + $0xa40] ss:$16 sps:$4 sm:$0xff]  }
 0x23a   :  { %4340 = vmatprep.subr.bf16.mxu1 %v5999_v4  ;;  %v6069_v4 = vld [vmem:[#allocation7 + $0xa48] ss:$16 sps:$4 sm:$0xff]  }
 0x23c   :  { %4013 = vmatpush1.bf16.msra.mxu0 %v5994_v5  ;;  %v6074_v5 = vld [vmem:[#allocation7 + $0xa64] ss:$16 sps:$4 sm:$0xff]  }
 0x23d   :  { %4341 = vmatpush1.bf16.msra.mxu1 %v5997_v60  ;;  %4014 = vmatprep.subr.bf16.mxu0 %v6002_v6  ;;  %v6072_v60 = vld [vmem:[#allocation7 + $0xa60] ss:$16 sps:$4 sm:$0xff]   ;;  %v6075_v6 = vld [vmem:[#allocation7 + $0xa68] ss:$16 sps:$4 sm:$0xff]  }
 0x23e   :  { %4342 = vmatprep.subr.bf16.mxu1 %v6005_v11  ;;  %v6080_v11 = vld [vmem:[#allocation7 + $0xa84] ss:$16 sps:$4 sm:$0xff]  }
 0x240   :  { %4015 = vmatpush1.bf16.msra.mxu0 %v6000_v12  ;;  %v6083_v12 = vld [vmem:[#allocation7 + $0xa8c] ss:$16 sps:$4 sm:$0xff]  }
 0x241   :  { %4343 = vmatpush1.bf16.msra.mxu1 %v6003_v16  ;;  %4016 = vmatprep.subr.bf16.mxu0 %v6008_v17  ;;  %v6078_v16 = vld [vmem:[#allocation7 + $0xa80] ss:$16 sps:$4 sm:$0xff]   ;;  %v6081_v17 = vld [vmem:[#allocation7 + $0xa88] ss:$16 sps:$4 sm:$0xff]  }
 0x242   :  { %4344 = vmatprep.subr.bf16.mxu1 %v6011_v8  ;;  %v6086_v8 = vld [vmem:[#allocation7 + $0xaa4] ss:$16 sps:$4 sm:$0xff]  }
 0x244   :  { %4017 = vmatpush1.bf16.msra.mxu0 %v6006_v15  ;;  %v6089_v15 = vld [vmem:[#allocation7 + $0xaac] ss:$16 sps:$4 sm:$0xff]  }
 0x245   :  { %4345 = vmatpush1.bf16.msra.mxu1 %v6009_v34  ;;  %4018 = vmatprep.subr.bf16.mxu0 %v6014_v18  ;;  %v6084_v34 = vld [vmem:[#allocation7 + $0xaa0] ss:$16 sps:$4 sm:$0xff]   ;;  %v6087_v18 = vld [vmem:[#allocation7 + $0xaa8] ss:$16 sps:$4 sm:$0xff]  }
 0x246   :  { %4346 = vmatprep.subr.bf16.mxu1 %v6017_v19  ;;  %v6092_v19 = vld [vmem:[#allocation7 + $0xac4] ss:$16 sps:$4 sm:$0xff]  }
 0x248   :  { %4019 = vmatpush1.bf16.msra.mxu0 %v6012_v20  ;;  %v6095_v20 = vld [vmem:[#allocation7 + $0xacc] ss:$16 sps:$4 sm:$0xff]  }
 0x249   :  { %4347 = vmatpush1.bf16.msra.mxu1 %v6015_v41  ;;  %4020 = vmatprep.subr.bf16.mxu0 %v6020_v22  ;;  %v6090_v41 = vld [vmem:[#allocation7 + $0xac0] ss:$16 sps:$4 sm:$0xff]   ;;  %v6093_v22 = vld [vmem:[#allocation7 + $0xac8] ss:$16 sps:$4 sm:$0xff]  }
 0x24a   :  { %4348 = vmatprep.subr.bf16.mxu1 %v6023_v23  ;;  %v6098_v23 = vld [vmem:[#allocation7 + $0xae4] ss:$16 sps:$4 sm:$0xff]  }
 0x24c   :  { %4021 = vmatpush1.bf16.msra.mxu0 %v6018_v24  ;;  %v6101_v24 = vld [vmem:[#allocation7 + $0xaec] ss:$16 sps:$4 sm:$0xff]  }
 0x24d   :  { %4349 = vmatpush1.bf16.msra.mxu1 %v6021_v26  ;;  %4022 = vmatprep.subr.bf16.mxu0 %v6026_v28  ;;  %v6096_v26 = vld [vmem:[#allocation7 + $0xae0] ss:$16 sps:$4 sm:$0xff]   ;;  %v6099_v28 = vld [vmem:[#allocation7 + $0xae8] ss:$16 sps:$4 sm:$0xff]  }
 0x24e   :  { %4350 = vmatprep.subr.bf16.mxu1 %v6029_v31  ;;  %v6104_v31 = vld [vmem:[#allocation7 + $0xb04] ss:$16 sps:$4 sm:$0xff]  }
 0x250   :  { %4023 = vmatpush1.bf16.msra.mxu0 %v6024_v32  ;;  %v6107_v32 = vld [vmem:[#allocation7 + $0xb0c] ss:$16 sps:$4 sm:$0xff]  }
 0x251   :  { %4351 = vmatpush1.bf16.msra.mxu1 %v6027_v33  ;;  %4024 = vmatprep.subr.bf16.mxu0 %v6032_v35  ;;  %v6102_v33 = vld [vmem:[#allocation7 + $0xb00] ss:$16 sps:$4 sm:$0xff]   ;;  %v6105_v35 = vld [vmem:[#allocation7 + $0xb08] ss:$16 sps:$4 sm:$0xff]  }
 0x252   :  { %4352 = vmatprep.subr.bf16.mxu1 %v6035_v38  ;;  %v6110_v38 = vld [vmem:[#allocation7 + $0xb24] ss:$16 sps:$4 sm:$0xff]  }
 0x254   :  { %4025 = vmatpush1.bf16.msra.mxu0 %v6030_v7  ;;  %v6113_v7 = vld [vmem:[#allocation7 + $0xb2c] ss:$16 sps:$4 sm:$0xff]  }
 0x255   :  { %4353 = vmatpush1.bf16.msra.mxu1 %v6033_v14  ;;  %4026 = vmatprep.subr.bf16.mxu0 %v6038_v40  ;;  %v6108_v14 = vld [vmem:[#allocation7 + $0xb20] ss:$16 sps:$4 sm:$0xff]   ;;  %v6111_v40 = vld [vmem:[#allocation7 + $0xb28] ss:$16 sps:$4 sm:$0xff]  }
 0x256   :  { %4354 = vmatprep.subr.bf16.mxu1 %v6041_v42  ;;  %v6116_v42 = vld [vmem:[#allocation7 + $0xb44] ss:$16 sps:$4 sm:$0xff]  }
 0x258   :  { %4027 = vmatpush1.bf16.msra.mxu0 %v6036_v43  ;;  %v6119_v43 = vld [vmem:[#allocation7 + $0xb4c] ss:$16 sps:$4 sm:$0xff]  }
 0x259   :  { %4355 = vmatpush1.bf16.msra.mxu1 %v6039_v44  ;;  %4028 = vmatprep.subr.bf16.mxu0 %v6044_v45  ;;  %v6114_v44 = vld [vmem:[#allocation7 + $0xb40] ss:$16 sps:$4 sm:$0xff]   ;;  %v6117_v45 = vld [vmem:[#allocation7 + $0xb48] ss:$16 sps:$4 sm:$0xff]  }
 0x25a   :  { %4356 = vmatprep.subr.bf16.mxu1 %v6047_v13  ;;  %v6122_v13 = vld [vmem:[#allocation7 + $0xb64] ss:$16 sps:$4 sm:$0xff]  }
 0x25c   :  { %4029 = vmatpush1.bf16.msra.mxu0 %v6042_v39  ;;  %v6125_v39 = vld [vmem:[#allocation7 + $0xb6c] ss:$16 sps:$4 sm:$0xff]  }
 0x25d   :  { %4357 = vmatpush1.bf16.msra.mxu1 %v6045_v21  ;;  %4030 = vmatprep.subr.bf16.mxu0 %v6050_v57  ;;  %v6123_v21 = vld [vmem:[#allocation7 + $0xb68] ss:$16 sps:$4 sm:$0xff]   ;;  %v6128_v57 = vld [vmem:[#allocation7 + $0xb84] ss:$16 sps:$4 sm:$0xff]  }
 0x25e   :  { %4358 = vmatprep.subr.bf16.mxu1 %v6053_v47  ;;  %v6131_v47 = vld [vmem:[#allocation7 + $0xb8c] ss:$16 sps:$4 sm:$0xff]  }
 0x260   :  { %4031 = vmatpush1.bf16.msra.mxu0 %v6048_v48  ;;  %v6126_v48 = vld [vmem:[#allocation7 + $0xb80] ss:$16 sps:$4 sm:$0xff]  }
 0x261   :  { %4359 = vmatpush1.bf16.msra.mxu1 %v6051_v37  ;;  %4041 = vmatprep.subr.bf16.mxu0 %v6056_v51  ;;  %v6134_v37 = vld [vmem:[#allocation7 + $0xba4] ss:$16 sps:$4 sm:$0xff]   ;;  %v6137_v51 = vld [vmem:[#allocation7 + $0xbac] ss:$16 sps:$4 sm:$0xff]  }
 0x262   :  { %4369 = vmatprep.subr.bf16.mxu1 %v6059_v53  ;;  %v6132_v53 = vld [vmem:[#allocation7 + $0xba0] ss:$16 sps:$4 sm:$0xff]  }
 0x263   :  { %4033 = vmatmul.mubr.bf16.vlgmr.msra.gmra.mrb[16].mxu0 %v734_v55 }
 0x264   :  { %4361 = vmatmul.mubr.bf16.vlgmr.msra.gmra.mrb[16].mxu1 %v734_v55  ;;  %4042 = vmatpush1.bf16.msra.mxu0 %v6054_v54  ;;  %v6135_v54 = vld [vmem:[#allocation7 + $0xba8] ss:$16 sps:$4 sm:$0xff]   ;;  %v6140_v55 = vld [vmem:[#allocation7 + $0xbc4] ss:$16 sps:$4 sm:$0xff]  }
 0x265   :  { %4073 = vmatprep.mubr.bf16.mxu0 %v737_v58  ;;  %4370 = vmatpush1.bf16.msra.mxu1 %v6057_v29  ;;  %v6143_v29 = vld [vmem:[#allocation7 + $0xbcc] ss:$16 sps:$4 sm:$0xff]  }
 0x266   :  { %4401 = vmatprep.mubr.bf16.mxu1 %v737_v58  ;;  %4043 = vmatprep.subr.bf16.mxu0 %v6062_v56  ;;  %v6138_v56 = vld [vmem:[#allocation7 + $0xbc0] ss:$16 sps:$4 sm:$0xff]   ;;  %v6141_v58 = vld [vmem:[#allocation7 + $0xbc8] ss:$16 sps:$4 sm:$0xff]  }
 0x267   :  { %4371 = vmatprep.subr.bf16.mxu1 %v6065_v59  ;;  %v6146_v59 = vld [vmem:[#allocation7 + $0xbe4] ss:$16 sps:$4 sm:$0xff]  }
 0x268   :  { %4044 = vmatpush1.bf16.msra.mxu0 %v6060_v52  ;;  %v6149_v52 = vld [vmem:[#allocation7 + $0xbec] ss:$16 sps:$4 sm:$0xff]  }
 0x269   :  { %4372 = vmatpush1.bf16.msra.mxu1 %v6063_v62  ;;  %4045 = vmatprep.subr.bf16.mxu0 %v6068_v63  ;;  %v6144_v62 = vld [vmem:[#allocation7 + $0xbe0] ss:$16 sps:$4 sm:$0xff]   ;;  %v6147_v63 = vld [vmem:[#allocation7 + $0xbe8] ss:$16 sps:$4 sm:$0xff]  }
 0x26a   :  { %4373 = vmatprep.subr.bf16.mxu1 %v6071_v1  ;;  %v6152_v1 = vld [vmem:[#allocation7 + $0xc04] ss:$16 sps:$4 sm:$0xff]  }
 0x26c   :  { %4046 = vmatpush1.bf16.msra.mxu0 %v6066_v2  ;;  %v6155_v2 = vld [vmem:[#allocation7 + $0xc0c] ss:$16 sps:$4 sm:$0xff]  }
 0x26d   :  { %4374 = vmatpush1.bf16.msra.mxu1 %v6069_v4  ;;  %4047 = vmatprep.subr.bf16.mxu0 %v6074_v5  ;;  %v6150_v4 = vld [vmem:[#allocation7 + $0xc00] ss:$16 sps:$4 sm:$0xff]   ;;  %v736_v5 = vpack.c.bf16 %v6754_v61, %v6754_v61  ;;  %v6167_v61 = vld [vmem:[#allocation7 + $0xc4c] ss:$16 sps:$4 sm:$0xff]  }
 0x26e   :  { %4375 = vmatprep.subr.bf16.mxu1 %v6077_v3  ;;  %v6153_v3 = vld [vmem:[#allocation7 + $0xc08] ss:$16 sps:$4 sm:$0xff]  }
 0x270   :  { %4048 = vmatpush1.bf16.msra.mxu0 %v6072_v60  ;;  %v6158_v60 = vld [vmem:[#allocation7 + $0xc24] ss:$16 sps:$4 sm:$0xff]  }
 0x271   :  { %4376 = vmatpush1.bf16.msra.mxu1 %v6075_v6  ;;  %4049 = vmatprep.subr.bf16.mxu0 %v6080_v11  ;;  %v739_v6 = vpack.c.bf16 %v6771_v27, %v6771_v27  ;;  %v6161_v11 = vld [vmem:[#allocation7 + $0xc2c] ss:$16 sps:$4 sm:$0xff]  }
 0x272   :  { %4377 = vmatprep.subr.bf16.mxu1 %v6083_v12  ;;  %v6156_v12 = vld [vmem:[#allocation7 + $0xc20] ss:$16 sps:$4 sm:$0xff]   ;;  %v6173_v27 = vld [vmem:[#allocation7 + $0xc6c] ss:$16 sps:$4 sm:$0xff]  }
 0x274   :  { %4050 = vmatpush1.bf16.msra.mxu0 %v6078_v16  ;;  %v6159_v16 = vld [vmem:[#allocation7 + $0xc28] ss:$16 sps:$4 sm:$0xff]  }
 0x275   :  { %4378 = vmatpush1.bf16.msra.mxu1 %v6081_v17  ;;  %4051 = vmatprep.subr.bf16.mxu0 %v6086_v8  ;;  %v6164_v17 = vld [vmem:[#allocation7 + $0xc44] ss:$16 sps:$4 sm:$0xff]   ;;  %v6162_v8 = vld [vmem:[#allocation7 + $0xc40] ss:$16 sps:$4 sm:$0xff]  }
 0x276   :  { %4379 = vmatprep.subr.bf16.mxu1 %v6089_v15  ;;  %v6165_v15 = vld [vmem:[#allocation7 + $0xc48] ss:$16 sps:$4 sm:$0xff]  }
 0x278   :  { %4052 = vmatpush1.bf16.msra.mxu0 %v6084_v34  ;;  %v6170_v34 = vld [vmem:[#allocation7 + $0xc64] ss:$16 sps:$4 sm:$0xff]  }
 0x279   :  { %4380 = vmatpush1.bf16.msra.mxu1 %v6087_v18  ;;  %4053 = vmatprep.subr.bf16.mxu0 %v6092_v19  ;;  %v6168_v18 = vld [vmem:[#allocation7 + $0xc60] ss:$16 sps:$4 sm:$0xff]   ;;  %v6171_v19 = vld [vmem:[#allocation7 + $0xc68] ss:$16 sps:$4 sm:$0xff]  }
 0x27a   :  { %4381 = vmatprep.subr.bf16.mxu1 %v6095_v20  ;;  %v6176_v20 = vld [vmem:[#allocation7 + $0xc84] ss:$16 sps:$4 sm:$0xff]  }
 0x27c   :  { %4054 = vmatpush1.bf16.msra.mxu0 %v6090_v41  ;;  %v6179_v41 = vld [vmem:[#allocation7 + $0xc8c] ss:$16 sps:$4 sm:$0xff]  }
 0x27d   :  { %4382 = vmatpush1.bf16.msra.mxu1 %v6093_v22  ;;  %4055 = vmatprep.subr.bf16.mxu0 %v6098_v23  ;;  %v6174_v22 = vld [vmem:[#allocation7 + $0xc80] ss:$16 sps:$4 sm:$0xff]   ;;  %v6177_v23 = vld [vmem:[#allocation7 + $0xc88] ss:$16 sps:$4 sm:$0xff]  }
 0x27e   :  { %4383 = vmatprep.subr.bf16.mxu1 %v6101_v24  ;;  %v6182_v24 = vld [vmem:[#allocation7 + $0xca4] ss:$16 sps:$4 sm:$0xff]  }
 0x280   :  { %4056 = vmatpush1.bf16.msra.mxu0 %v6096_v26  ;;  %v6185_v26 = vld [vmem:[#allocation7 + $0xcac] ss:$16 sps:$4 sm:$0xff]  }
 0x281   :  { %4384 = vmatpush1.bf16.msra.mxu1 %v6099_v28  ;;  %4057 = vmatprep.subr.bf16.mxu0 %v6104_v31  ;;  %v6180_v28 = vld [vmem:[#allocation7 + $0xca0] ss:$16 sps:$4 sm:$0xff]   ;;  %v6183_v31 = vld [vmem:[#allocation7 + $0xca8] ss:$16 sps:$4 sm:$0xff]  }
 0x282   :  { %4385 = vmatprep.subr.bf16.mxu1 %v6107_v32  ;;  %v6188_v32 = vld [vmem:[#allocation7 + $0xcc4] ss:$16 sps:$4 sm:$0xff]  }
 0x284   :  { %4058 = vmatpush1.bf16.msra.mxu0 %v6102_v33  ;;  %v6191_v33 = vld [vmem:[#allocation7 + $0xccc] ss:$16 sps:$4 sm:$0xff]  }
 0x285   :  { %4386 = vmatpush1.bf16.msra.mxu1 %v6105_v35  ;;  %4059 = vmatprep.subr.bf16.mxu0 %v6110_v38  ;;  %v6186_v35 = vld [vmem:[#allocation7 + $0xcc0] ss:$16 sps:$4 sm:$0xff]   ;;  %v6189_v38 = vld [vmem:[#allocation7 + $0xcc8] ss:$16 sps:$4 sm:$0xff]  }
 0x286   :  { %4387 = vmatprep.subr.bf16.mxu1 %v6113_v7  ;;  %v6194_v7 = vld [vmem:[#allocation7 + $0xce4] ss:$16 sps:$4 sm:$0xff]  }
 0x288   :  { %4060 = vmatpush1.bf16.msra.mxu0 %v6108_v14  ;;  %v6197_v14 = vld [vmem:[#allocation7 + $0xcec] ss:$16 sps:$4 sm:$0xff]  }
 0x289   :  { %4388 = vmatpush1.bf16.msra.mxu1 %v6111_v40  ;;  %4061 = vmatprep.subr.bf16.mxu0 %v6116_v42  ;;  %v6192_v40 = vld [vmem:[#allocation7 + $0xce0] ss:$16 sps:$4 sm:$0xff]   ;;  %v6195_v42 = vld [vmem:[#allocation7 + $0xce8] ss:$16 sps:$4 sm:$0xff]  }
 0x28a   :  { %4389 = vmatprep.subr.bf16.mxu1 %v6119_v43  ;;  %v6200_v43 = vld [vmem:[#allocation7 + $0xd04] ss:$16 sps:$4 sm:$0xff]  }
 0x28c   :  { %4062 = vmatpush1.bf16.msra.mxu0 %v6114_v44  ;;  %v6203_v44 = vld [vmem:[#allocation7 + $0xd0c] ss:$16 sps:$4 sm:$0xff]  }
 0x28d   :  { %4390 = vmatpush1.bf16.msra.mxu1 %v6117_v45  ;;  %4063 = vmatprep.subr.bf16.mxu0 %v6122_v13  ;;  %v6198_v45 = vld [vmem:[#allocation7 + $0xd00] ss:$16 sps:$4 sm:$0xff]   ;;  %v6201_v13 = vld [vmem:[#allocation7 + $0xd08] ss:$16 sps:$4 sm:$0xff]  }
 0x28e   :  { %4391 = vmatprep.subr.bf16.mxu1 %v6125_v39  ;;  %v6206_v39 = vld [vmem:[#allocation7 + $0xd24] ss:$16 sps:$4 sm:$0xff]  }
 0x290   :  { %4064 = vmatpush1.bf16.msra.mxu0 %v6120_v46  ;;  %v6209_v46 = vld [vmem:[#allocation7 + $0xd2c] ss:$16 sps:$4 sm:$0xff]  }
 0x291   :  { %4392 = vmatpush1.bf16.msra.mxu1 %v6123_v21  ;;  %4065 = vmatprep.subr.bf16.mxu0 %v6128_v57  ;;  %v6204_v21 = vld [vmem:[#allocation7 + $0xd20] ss:$16 sps:$4 sm:$0xff]   ;;  %v6207_v57 = vld [vmem:[#allocation7 + $0xd28] ss:$16 sps:$4 sm:$0xff]  }
 0x292   :  { %4393 = vmatprep.subr.bf16.mxu1 %v6131_v47  ;;  %v6212_v47 = vld [vmem:[#allocation7 + $0xd44] ss:$16 sps:$4 sm:$0xff]  }
 0x294   :  { %4066 = vmatpush1.bf16.msra.mxu0 %v6126_v48  ;;  %v6215_v48 = vld [vmem:[#allocation7 + $0xd4c] ss:$16 sps:$4 sm:$0xff]  }
 0x295   :  { %4394 = vmatpush1.bf16.msra.mxu1 %v6129_v50  ;;  %4067 = vmatprep.subr.bf16.mxu0 %v6134_v37  ;;  %v6210_v50 = vld [vmem:[#allocation7 + $0xd40] ss:$16 sps:$4 sm:$0xff]   ;;  %v6213_v37 = vld [vmem:[#allocation7 + $0xd48] ss:$16 sps:$4 sm:$0xff]  }
 0x296   :  { %4395 = vmatprep.subr.bf16.mxu1 %v6137_v51  ;;  %v6218_v51 = vld [vmem:[#allocation7 + $0xd64] ss:$16 sps:$4 sm:$0xff]  }
 0x298   :  { %4068 = vmatpush1.bf16.msra.mxu0 %v6132_v53  ;;  %v6221_v53 = vld [vmem:[#allocation7 + $0xd6c] ss:$16 sps:$4 sm:$0xff]  }
 0x299   :  { %4396 = vmatpush1.bf16.msra.mxu1 %v6135_v54  ;;  %4069 = vmatprep.subr.bf16.mxu0 %v6140_v55  ;;  %v6216_v54 = vld [vmem:[#allocation7 + $0xd60] ss:$16 sps:$4 sm:$0xff]   ;;  %v6219_v55 = vld [vmem:[#allocation7 + $0xd68] ss:$16 sps:$4 sm:$0xff]  }
 0x29a   :  { %4397 = vmatprep.subr.bf16.mxu1 %v6143_v29  ;;  %v6224_v29 = vld [vmem:[#allocation7 + $0xd84] ss:$16 sps:$4 sm:$0xff]  }
 0x29c   :  { %4070 = vmatpush1.bf16.msra.mxu0 %v6138_v56  ;;  %v6227_v56 = vld [vmem:[#allocation7 + $0xd8c] ss:$16 sps:$4 sm:$0xff]  }
 0x29d   :  { %4398 = vmatpush1.bf16.msra.mxu1 %v6141_v58  ;;  %4071 = vmatprep.subr.bf16.mxu0 %v6146_v59  ;;  %v6222_v58 = vld [vmem:[#allocation7 + $0xd80] ss:$16 sps:$4 sm:$0xff]   ;;  %v6225_v59 = vld [vmem:[#allocation7 + $0xd88] ss:$16 sps:$4 sm:$0xff]  }
 0x29e   :  { %4399 = vmatprep.subr.bf16.mxu1 %v6149_v52  ;;  %v6230_v52 = vld [vmem:[#allocation7 + $0xda4] ss:$16 sps:$4 sm:$0xff]  }
 0x2a0   :  { %4072 = vmatpush1.bf16.msra.mxu0 %v6144_v62  ;;  %v6233_v62 = vld [vmem:[#allocation7 + $0xdac] ss:$16 sps:$4 sm:$0xff]  }
 0x2a1   :  { %4400 = vmatpush1.bf16.msra.mxu1 %v6147_v63  ;;  %4082 = vmatprep.subr.bf16.mxu0 %v6152_v1  ;;  %v6228_v63 = vld [vmem:[#allocation7 + $0xda0] ss:$16 sps:$4 sm:$0xff]   ;;  %v6231_v1 = vld [vmem:[#allocation7 + $0xda8] ss:$16 sps:$4 sm:$0xff]  }
 0x2a2   :  { %4410 = vmatprep.subr.bf16.mxu1 %v6155_v2  ;;  %v6236_v2 = vld [vmem:[#allocation7 + $0xdc4] ss:$16 sps:$4 sm:$0xff]  }
 0x2a3   :  { %4074 = vmatmul.mubr.bf16.vlgmr.msra.gmra.mrb[16].mxu0 %v736_v5 }
 0x2a4   :  { %4402 = vmatmul.mubr.bf16.vlgmr.msra.gmra.mrb[16].mxu1 %v736_v5  ;;  %4083 = vmatpush1.bf16.msra.mxu0 %v6150_v4  ;;  %v6239_v4 = vld [vmem:[#allocation7 + $0xdcc] ss:$16 sps:$4 sm:$0xff]   ;;  %v6234_v5 = vld [vmem:[#allocation7 + $0xdc0] ss:$16 sps:$4 sm:$0xff]  }
 0x2a5   :  { %4114 = vmatprep.mubr.bf16.mxu0 %v739_v6  ;;  %4411 = vmatpush1.bf16.msra.mxu1 %v6153_v3  ;;  %v6237_v3 = vld [vmem:[#allocation7 + $0xdc8] ss:$16 sps:$4 sm:$0xff]  }
 0x2a6   :  { %4442 = vmatprep.mubr.bf16.mxu1 %v739_v6  ;;  %4084 = vmatprep.subr.bf16.mxu0 %v6158_v60  ;;  %v6242_v60 = vld [vmem:[#allocation7 + $0xde4] ss:$16 sps:$4 sm:$0xff]   ;;  %v6245_v6 = vld [vmem:[#allocation7 + $0xdec] ss:$16 sps:$4 sm:$0xff]  }
 0x2a7   :  { %4412 = vmatprep.subr.bf16.mxu1 %v6161_v11  ;;  %v6240_v11 = vld [vmem:[#allocation7 + $0xde0] ss:$16 sps:$4 sm:$0xff]  }
 0x2a8   :  { %4085 = vmatpush1.bf16.msra.mxu0 %v6156_v12  ;;  %v6243_v12 = vld [vmem:[#allocation7 + $0xde8] ss:$16 sps:$4 sm:$0xff]  }
 0x2a9   :  { %4413 = vmatpush1.bf16.msra.mxu1 %v6159_v16  ;;  %4086 = vmatprep.subr.bf16.mxu0 %v6164_v17  ;;  %v6248_v16 = vld [vmem:[#allocation7 + $0xe04] ss:$16 sps:$4 sm:$0xff]   ;;  %v6251_v17 = vld [vmem:[#allocation7 + $0xe0c] ss:$16 sps:$4 sm:$0xff]  }
 0x2aa   :  { %4414 = vmatprep.subr.bf16.mxu1 %v6167_v61  ;;  %v6246_v61 = vld [vmem:[#allocation7 + $0xe00] ss:$16 sps:$4 sm:$0xff]  }
 0x2ac   :  { %4087 = vmatpush1.bf16.msra.mxu0 %v6162_v8  ;;  %v738_v8 = vpack.c.bf16 %v6769_v25, %v6769_v25  ;;  %v6263_v25 = vld [vmem:[#allocation7 + $0xe4c] ss:$16 sps:$4 sm:$0xff]  }
 0x2ad   :  { %4415 = vmatpush1.bf16.msra.mxu1 %v6165_v15  ;;  %4088 = vmatprep.subr.bf16.mxu0 %v6170_v34  ;;  %v6249_v15 = vld [vmem:[#allocation7 + $0xe08] ss:$16 sps:$4 sm:$0xff]   ;;  %v6254_v34 = vld [vmem:[#allocation7 + $0xe24] ss:$16 sps:$4 sm:$0xff]  }
 0x2ae   :  { %4416 = vmatprep.subr.bf16.mxu1 %v6173_v27  ;;  %v741_v27 = vpack.c.bf16 %v6775_v36, %v6775_v36  ;;  %v6269_v36 = vld [vmem:[#allocation7 + $0xe6c] ss:$16 sps:$4 sm:$0xff]  }
 0x2b0   :  { %4089 = vmatpush1.bf16.msra.mxu0 %v6168_v18  ;;  %v6257_v18 = vld [vmem:[#allocation7 + $0xe2c] ss:$16 sps:$4 sm:$0xff]  }
 0x2b1   :  { %4417 = vmatpush1.bf16.msra.mxu1 %v6171_v19  ;;  %4090 = vmatprep.subr.bf16.mxu0 %v6176_v20  ;;  %v6252_v19 = vld [vmem:[#allocation7 + $0xe20] ss:$16 sps:$4 sm:$0xff]   ;;  %v6255_v20 = vld [vmem:[#allocation7 + $0xe28] ss:$16 sps:$4 sm:$0xff]  }
 0x2b2   :  { %4418 = vmatprep.subr.bf16.mxu1 %v6179_v41  ;;  %v6260_v41 = vld [vmem:[#allocation7 + $0xe44] ss:$16 sps:$4 sm:$0xff]  }
 0x2b4   :  { %4091 = vmatpush1.bf16.msra.mxu0 %v6174_v22  ;;  %v6258_v22 = vld [vmem:[#allocation7 + $0xe40] ss:$16 sps:$4 sm:$0xff]  }
 0x2b5   :  { %4419 = vmatpush1.bf16.msra.mxu1 %v6177_v23  ;;  %4092 = vmatprep.subr.bf16.mxu0 %v6182_v24  ;;  %v6261_v23 = vld [vmem:[#allocation7 + $0xe48] ss:$16 sps:$4 sm:$0xff]   ;;  %v6266_v24 = vld [vmem:[#allocation7 + $0xe64] ss:$16 sps:$4 sm:$0xff]  }
 0x2b6   :  { %4420 = vmatprep.subr.bf16.mxu1 %v6185_v26  ;;  %v6264_v26 = vld [vmem:[#allocation7 + $0xe60] ss:$16 sps:$4 sm:$0xff]  }
 0x2b8   :  { %4093 = vmatpush1.bf16.msra.mxu0 %v6180_v28  ;;  %v6267_v28 = vld [vmem:[#allocation7 + $0xe68] ss:$16 sps:$4 sm:$0xff]  }
 0x2b9   :  { %4421 = vmatpush1.bf16.msra.mxu1 %v6183_v31  ;;  %4094 = vmatprep.subr.bf16.mxu0 %v6188_v32  ;;  %v6272_v31 = vld [vmem:[#allocation7 + $0xe84] ss:$16 sps:$4 sm:$0xff]   ;;  %v6275_v32 = vld [vmem:[#allocation7 + $0xe8c] ss:$16 sps:$4 sm:$0xff]  }
 0x2ba   :  { %4422 = vmatprep.subr.bf16.mxu1 %v6191_v33  ;;  %v6270_v33 = vld [vmem:[#allocation7 + $0xe80] ss:$16 sps:$4 sm:$0xff]  }
 0x2bc   :  { %4095 = vmatpush1.bf16.msra.mxu0 %v6186_v35  ;;  %v6273_v35 = vld [vmem:[#allocation7 + $0xe88] ss:$16 sps:$4 sm:$0xff]  }
 0x2bd   :  { %4423 = vmatpush1.bf16.msra.mxu1 %v6189_v38  ;;  %4096 = vmatprep.subr.bf16.mxu0 %v6194_v7  ;;  %v6278_v38 = vld [vmem:[#allocation7 + $0xea4] ss:$16 sps:$4 sm:$0xff]   ;;  %v6281_v7 = vld [vmem:[#allocation7 + $0xeac] ss:$16 sps:$4 sm:$0xff]  }
 0x2be   :  { %4424 = vmatprep.subr.bf16.mxu1 %v6197_v14  ;;  %v6276_v14 = vld [vmem:[#allocation7 + $0xea0] ss:$16 sps:$4 sm:$0xff]  }
 0x2c0   :  { %4097 = vmatpush1.bf16.msra.mxu0 %v6192_v40  ;;  %v6279_v40 = vld [vmem:[#allocation7 + $0xea8] ss:$16 sps:$4 sm:$0xff]  }
 0x2c1   :  { %4425 = vmatpush1.bf16.msra.mxu1 %v6195_v42  ;;  %4098 = vmatprep.subr.bf16.mxu0 %v6200_v43  ;;  %v6284_v42 = vld [vmem:[#allocation7 + $0xec4] ss:$16 sps:$4 sm:$0xff]   ;;  %v6287_v43 = vld [vmem:[#allocation7 + $0xecc] ss:$16 sps:$4 sm:$0xff]  }
 0x2c2   :  { %4426 = vmatprep.subr.bf16.mxu1 %v6203_v44  ;;  %v6282_v44 = vld [vmem:[#allocation7 + $0xec0] ss:$16 sps:$4 sm:$0xff]  }
 0x2c4   :  { %4099 = vmatpush1.bf16.msra.mxu0 %v6198_v45  ;;  %v6285_v45 = vld [vmem:[#allocation7 + $0xec8] ss:$16 sps:$4 sm:$0xff]  }
 0x2c5   :  { %4427 = vmatpush1.bf16.msra.mxu1 %v6201_v13  ;;  %4100 = vmatprep.subr.bf16.mxu0 %v6206_v39  ;;  %v6290_v13 = vld [vmem:[#allocation7 + $0xee4] ss:$16 sps:$4 sm:$0xff]   ;;  %v6293_v39 = vld [vmem:[#allocation7 + $0xeec] ss:$16 sps:$4 sm:$0xff]  }
 0x2c6   :  { %4428 = vmatprep.subr.bf16.mxu1 %v6209_v46  ;;  %v6288_v46 = vld [vmem:[#allocation7 + $0xee0] ss:$16 sps:$4 sm:$0xff]  }
 0x2c8   :  { %4101 = vmatpush1.bf16.msra.mxu0 %v6204_v21  ;;  %v6291_v21 = vld [vmem:[#allocation7 + $0xee8] ss:$16 sps:$4 sm:$0xff]  }
 0x2c9   :  { %4429 = vmatpush1.bf16.msra.mxu1 %v6207_v57  ;;  %4102 = vmatprep.subr.bf16.mxu0 %v6212_v47  ;;  %v6296_v57 = vld [vmem:[#allocation7 + $0xf04] ss:$16 sps:$4 sm:$0xff]   ;;  %v6299_v47 = vld [vmem:[#allocation7 + $0xf0c] ss:$16 sps:$4 sm:$0xff]  }
 0x2ca   :  { %4430 = vmatprep.subr.bf16.mxu1 %v6215_v48  ;;  %v6294_v48 = vld [vmem:[#allocation7 + $0xf00] ss:$16 sps:$4 sm:$0xff]  }
 0x2cc   :  { %4103 = vmatpush1.bf16.msra.mxu0 %v6210_v50  ;;  %v6297_v50 = vld [vmem:[#allocation7 + $0xf08] ss:$16 sps:$4 sm:$0xff]  }
 0x2cd   :  { %4431 = vmatpush1.bf16.msra.mxu1 %v6213_v37  ;;  %4104 = vmatprep.subr.bf16.mxu0 %v6218_v51  ;;  %v6302_v37 = vld [vmem:[#allocation7 + $0xf24] ss:$16 sps:$4 sm:$0xff]   ;;  %v6305_v51 = vld [vmem:[#allocation7 + $0xf2c] ss:$16 sps:$4 sm:$0xff]  }
 0x2ce   :  { %4432 = vmatprep.subr.bf16.mxu1 %v6221_v53  ;;  %v6300_v53 = vld [vmem:[#allocation7 + $0xf20] ss:$16 sps:$4 sm:$0xff]  }
 0x2d0   :  { %4105 = vmatpush1.bf16.msra.mxu0 %v6216_v54  ;;  %v6303_v54 = vld [vmem:[#allocation7 + $0xf28] ss:$16 sps:$4 sm:$0xff]  }
 0x2d1   :  { %4433 = vmatpush1.bf16.msra.mxu1 %v6219_v55  ;;  %4106 = vmatprep.subr.bf16.mxu0 %v6224_v29  ;;  %v6308_v55 = vld [vmem:[#allocation7 + $0xf44] ss:$16 sps:$4 sm:$0xff]   ;;  %v6311_v29 = vld [vmem:[#allocation7 + $0xf4c] ss:$16 sps:$4 sm:$0xff]  }
 0x2d2   :  { %4434 = vmatprep.subr.bf16.mxu1 %v6227_v56  ;;  %v6306_v56 = vld [vmem:[#allocation7 + $0xf40] ss:$16 sps:$4 sm:$0xff]  }
 0x2d4   :  { %4107 = vmatpush1.bf16.msra.mxu0 %v6222_v58  ;;  %v6309_v58 = vld [vmem:[#allocation7 + $0xf48] ss:$16 sps:$4 sm:$0xff]  }
 0x2d5   :  { %4435 = vmatpush1.bf16.msra.mxu1 %v6225_v59  ;;  %4108 = vmatprep.subr.bf16.mxu0 %v6230_v52  ;;  %v6314_v59 = vld [vmem:[#allocation7 + $0xf64] ss:$16 sps:$4 sm:$0xff]   ;;  %v6317_v52 = vld [vmem:[#allocation7 + $0xf6c] ss:$16 sps:$4 sm:$0xff]  }
 0x2d6   :  { %4436 = vmatprep.subr.bf16.mxu1 %v6233_v62  ;;  %v6312_v62 = vld [vmem:[#allocation7 + $0xf60] ss:$16 sps:$4 sm:$0xff]  }
 0x2d8   :  { %4109 = vmatpush1.bf16.msra.mxu0 %v6228_v63  ;;  %v6315_v63 = vld [vmem:[#allocation7 + $0xf68] ss:$16 sps:$4 sm:$0xff]  }
 0x2d9   :  { %4437 = vmatpush1.bf16.msra.mxu1 %v6231_v1  ;;  %4110 = vmatprep.subr.bf16.mxu0 %v6236_v2  ;;  %v6320_v1 = vld [vmem:[#allocation7 + $0xf84] ss:$16 sps:$4 sm:$0xff]   ;;  %v6323_v2 = vld [vmem:[#allocation7 + $0xf8c] ss:$16 sps:$4 sm:$0xff]  }
 0x2da   :  { %4438 = vmatprep.subr.bf16.mxu1 %v6239_v4  ;;  %v6318_v4 = vld [vmem:[#allocation7 + $0xf80] ss:$16 sps:$4 sm:$0xff]  }
 0x2dc   :  { %4111 = vmatpush1.bf16.msra.mxu0 %v6234_v5  ;;  %v6321_v5 = vld [vmem:[#allocation7 + $0xf88] ss:$16 sps:$4 sm:$0xff]  }
 0x2dd   :  { %4439 = vmatpush1.bf16.msra.mxu1 %v6237_v3  ;;  %4112 = vmatprep.subr.bf16.mxu0 %v6242_v60  ;;  %v6326_v3 = vld [vmem:[#allocation7 + $0xfa4] ss:$16 sps:$4 sm:$0xff]   ;;  %v6329_v60 = vld [vmem:[#allocation7 + $0xfac] ss:$16 sps:$4 sm:$0xff]  }
 0x2de   :  { %4440 = vmatprep.subr.bf16.mxu1 %v6245_v6  ;;  %v6324_v6 = vld [vmem:[#allocation7 + $0xfa0] ss:$16 sps:$4 sm:$0xff]  }
 0x2e0   :  { %4113 = vmatpush1.bf16.msra.mxu0 %v6240_v11  ;;  %v6327_v11 = vld [vmem:[#allocation7 + $0xfa8] ss:$16 sps:$4 sm:$0xff]  }
 0x2e1   :  { %4441 = vmatpush1.bf16.msra.mxu1 %v6243_v12  ;;  %4123 = vmatprep.subr.bf16.mxu0 %v6248_v16  ;;  %v6332_v12 = vld [vmem:[#allocation7 + $0xfc4] ss:$16 sps:$4 sm:$0xff]   ;;  %v6335_v16 = vld [vmem:[#allocation7 + $0xfcc] ss:$16 sps:$4 sm:$0xff]  }
 0x2e2   :  { %4451 = vmatprep.subr.bf16.mxu1 %v6251_v17  ;;  %v6330_v17 = vld [vmem:[#allocation7 + $0xfc0] ss:$16 sps:$4 sm:$0xff]  }
 0x2e3   :  { %4115 = vmatmul.mubr.bf16.vlgmr.msra.gmra.mrb[16].mxu0 %v738_v8 }
 0x2e4   :  { %4443 = vmatmul.mubr.bf16.vlgmr.msra.gmra.mrb[16].mxu1 %v738_v8  ;;  %4124 = vmatpush1.bf16.msra.mxu0 %v6246_v61  ;;  %v6333_v61 = vld [vmem:[#allocation7 + $0xfc8] ss:$16 sps:$4 sm:$0xff]   ;;  %v6338_v8 = vld [vmem:[#allocation7 + $0xfe4] ss:$16 sps:$4 sm:$0xff]  }
 0x2e5   :  { %4155 = vmatprep.mubr.bf16.mxu0 %v741_v27  ;;  %4452 = vmatpush1.bf16.msra.mxu1 %v6249_v15  ;;  %v6341_v15 = vld [vmem:[#allocation7 + $0xfec] ss:$16 sps:$4 sm:$0xff]  }
 0x2e6   :  { %4483 = vmatprep.mubr.bf16.mxu1 %v741_v27  ;;  %4125 = vmatprep.subr.bf16.mxu0 %v6254_v34  ;;  %v6336_v34 = vld [vmem:[#allocation7 + $0xfe0] ss:$16 sps:$4 sm:$0xff]   ;;  %v6339_v27 = vld [vmem:[#allocation7 + $0xfe8] ss:$16 sps:$4 sm:$0xff]  }
 0x2e7   :  { %4453 = vmatprep.subr.bf16.mxu1 %v6257_v18  ;;  %v6342_v18 = vld [vmem:[#allocation10 + $0x40] sm:$0xff]  }
 0x2e8   :  { %4126 = vmatpush1.bf16.msra.mxu0 %v6252_v19  ;;  %v6343_v19 = vld [vmem:[#allocation10 + $0xc0] sm:$0xff]  }
 0x2e9   :  { %4454 = vmatpush1.bf16.msra.mxu1 %v6255_v20  ;;  %4127 = vmatprep.subr.bf16.mxu0 %v6260_v41  ;;  %v6344_v20 = vld [vmem:[#allocation10] sm:$0xff]   ;;  %v740_v41 = vpack.c.bf16 %v6773_v30, %v6773_v30  ;;  %v6353_v30 = vld [vmem:[#allocation10 + $0x90] sm:$0xff]  }
 0x2ea   :  { %4455 = vmatprep.subr.bf16.mxu1 %v6263_v25  ;;  %v6345_v25 = vld [vmem:[#allocation10 + $0x80] sm:$0xff]  }
 0x2ec   :  { %4128 = vmatpush1.bf16.msra.mxu0 %v6258_v22  ;;  %v6346_v22 = vld [vmem:[#allocation10 + $0x48] sm:$0xff]  }
 0x2ed   :  { %4456 = vmatpush1.bf16.msra.mxu1 %v6261_v23  ;;  %4129 = vmatprep.subr.bf16.mxu0 %v6266_v24  ;;  %v6347_v23 = vld [vmem:[#allocation10 + $0xc8] sm:$0xff]  }
 0x2ee   :  { %4457 = vmatprep.subr.bf16.mxu1 %v6269_v36  ;;  %v6348_v24 = vld [vmem:[#allocation10 + $0x8] sm:$0xff]  }
 0x2ef   :  { %v6349_v36 = vld [vmem:[#allocation10 + $0x88] sm:$0xff]  }
 0x2f0   :  { %4130 = vmatpush1.bf16.msra.mxu0 %v6264_v26  ;;  %v6350_v26 = vld [vmem:[#allocation10 + $0x50] sm:$0xff]  }
 0x2f1   :  { %4458 = vmatpush1.bf16.msra.mxu1 %v6267_v28  ;;  %4131 = vmatprep.subr.bf16.mxu0 %v6272_v31  ;;  %v6351_v28 = vld [vmem:[#allocation10 + $0xd0] sm:$0xff]  }
 0x2f2   :  { %4459 = vmatprep.subr.bf16.mxu1 %v6275_v32  ;;  %v6352_v31 = vld [vmem:[#allocation10 + $0x10] sm:$0xff]   ;;  %v6354_v32 = vld [vmem:[#allocation10 + $0x58] sm:$0xff]  }
 0x2f4   :  { %4132 = vmatpush1.bf16.msra.mxu0 %v6270_v33  ;;  %v6355_v33 = vld [vmem:[#allocation10 + $0xd8] sm:$0xff]  }
 0x2f5   :  { %4460 = vmatpush1.bf16.msra.mxu1 %v6273_v35  ;;  %4133 = vmatprep.subr.bf16.mxu0 %v6278_v38  ;;  %v6356_v35 = vld [vmem:[#allocation10 + $0x18] sm:$0xff]  }
 0x2f6   :  { %4461 = vmatprep.subr.bf16.mxu1 %v6281_v7  ;;  %v6357_v38 = vld [vmem:[#allocation10 + $0x98] sm:$0xff]   ;;  %v6358_v7 = vld [vmem:[#allocation10 + $0x60] sm:$0xff]  }
 0x2f8   :  { %4134 = vmatpush1.bf16.msra.mxu0 %v6276_v14  ;;  %v6359_v14 = vld [vmem:[#allocation10 + $0xe0] sm:$0xff]  }
 0x2f9   :  { %4462 = vmatpush1.bf16.msra.mxu1 %v6279_v40  ;;  %4135 = vmatprep.subr.bf16.mxu0 %v6284_v42  ;;  %v6360_v40 = vld [vmem:[#allocation10 + $0x20] sm:$0xff]  }
 0x2fa   :  { %4463 = vmatprep.subr.bf16.mxu1 %v6287_v43  ;;  %v6361_v42 = vld [vmem:[#allocation10 + $0xa0] sm:$0xff]   ;;  %v6362_v43 = vld [vmem:[#allocation10 + $0x68] sm:$0xff]  }
 0x2fc   :  { %4136 = vmatpush1.bf16.msra.mxu0 %v6282_v44  ;;  %v6363_v44 = vld [vmem:[#allocation10 + $0xe8] sm:$0xff]  }
 0x2fd   :  { %4464 = vmatpush1.bf16.msra.mxu1 %v6285_v45  ;;  %4137 = vmatprep.subr.bf16.mxu0 %v6290_v13  ;;  %v6364_v45 = vld [vmem:[#allocation10 + $0x28] sm:$0xff]  }
 0x2fe   :  { %4465 = vmatprep.subr.bf16.mxu1 %v6293_v39  ;;  %v6365_v13 = vld [vmem:[#allocation10 + $0xa8] sm:$0xff]   ;;  %v6366_v39 = vld [vmem:[#allocation10 + $0x70] sm:$0xff]  }
 0x300   :  { %4138 = vmatpush1.bf16.msra.mxu0 %v6288_v46  ;;  %v6367_v46 = vld [vmem:[#allocation10 + $0xf0] sm:$0xff]  }
 0x301   :  { %4466 = vmatpush1.bf16.msra.mxu1 %v6291_v21  ;;  %4139 = vmatprep.subr.bf16.mxu0 %v6296_v57  ;;  %v6368_v21 = vld [vmem:[#allocation10 + $0x30] sm:$0xff]  }
 0x302   :  { %4467 = vmatprep.subr.bf16.mxu1 %v6299_v47  ;;  %v6369_v57 = vld [vmem:[#allocation10 + $0xb0] sm:$0xff]   ;;  %v6370_v47 = vld [vmem:[#allocation10 + $0x78] sm:$0xff]  }
 0x304   :  { %4140 = vmatpush1.bf16.msra.mxu0 %v6294_v48  ;;  %v6371_v48 = vld [vmem:[#allocation10 + $0xf8] sm:$0xff]  }
 0x305   :  { %4468 = vmatpush1.bf16.msra.mxu1 %v6297_v50  ;;  %4141 = vmatprep.subr.bf16.mxu0 %v6302_v37  ;;  %v6372_v50 = vld [vmem:[#allocation10 + $0x38] sm:$0xff]  }
 0x306   :  { %4469 = vmatprep.subr.bf16.mxu1 %v6305_v51  ;;  %v6373_v37 = vld [vmem:[#allocation10 + $0xb8] sm:$0xff]  }
 0x307   :  { %v1254_v51 = vld [vmem:[#allocation9] sm:$0xf] }
 0x308   :  { %4142 = vmatpush1.bf16.msra.mxu0 %v6300_v53  ;;  %v1259_v53 = vrot.slane %v1254_v51, %v6720_v9 }
 0x309   :  { %4470 = vmatpush1.bf16.msra.mxu1 %v6303_v54  ;;  %4143 = vmatprep.subr.bf16.mxu0 %v6308_v55  ;;  %v1267_v54 = vrot.slane %v1254_v51, %v6745_v49  ;;  %v1263_v55 = vrot.slane %v1254_v51, %v6723_v10 }
 0x30a   :  { %4471 = vmatprep.subr.bf16.mxu1 %v6311_v29  ;;  %v1271_v29 = vrot.slane %v1254_v51, %v6726_v0 }
 0x30c   :  { %4144 = vmatpush1.bf16.msra.mxu0 %v6306_v56 }
 0x30d   :  { %4472 = vmatpush1.bf16.msra.mxu1 %v6309_v58  ;;  %4145 = vmatprep.subr.bf16.mxu0 %v6314_v59 }
 0x30e   :  { %4473 = vmatprep.subr.bf16.mxu1 %v6317_v52 }
 0x310   :  { %4146 = vmatpush1.bf16.msra.mxu0 %v6312_v62 }
 0x311   :  { %4474 = vmatpush1.bf16.msra.mxu1 %v6315_v63  ;;  %4147 = vmatprep.subr.bf16.mxu0 %v6320_v1 }
 0x312   :  { %4475 = vmatprep.subr.bf16.mxu1 %v6323_v2 }
 0x314   :  { %4148 = vmatpush1.bf16.msra.mxu0 %v6318_v4 }
 0x315   :  { %4476 = vmatpush1.bf16.msra.mxu1 %v6321_v5  ;;  %4149 = vmatprep.subr.bf16.mxu0 %v6326_v3 }
 0x316   :  { %4477 = vmatprep.subr.bf16.mxu1 %v6329_v60 }
 0x318   :  { %4150 = vmatpush1.bf16.msra.mxu0 %v6324_v6 }
 0x319   :  { %4478 = vmatpush1.bf16.msra.mxu1 %v6327_v11  ;;  %4151 = vmatprep.subr.bf16.mxu0 %v6332_v12  ;;  %v5422_v12 = vld [vmem:[#allocation12] ss:$0 sm:$0xff] }
 0x31a   :  { %4479 = vmatprep.subr.bf16.mxu1 %v6335_v16 }
 0x31c   :  { %4152 = vmatpush1.bf16.msra.mxu0 %v6330_v17 }
 0x31d   :  { %4480 = vmatpush1.bf16.msra.mxu1 %v6333_v61  ;;  %4153 = vmatprep.subr.bf16.mxu0 %v6338_v8 }
 0x31e   :  { %4481 = vmatprep.subr.bf16.mxu1 %v6341_v15 }
 0x320   :  { %4154 = vmatpush1.bf16.msra.mxu0 %v6336_v34 }
 0x321   :  { %4482 = vmatpush1.bf16.msra.mxu1 %v6339_v27  ;;  %5455 = vmatprep.subr.bf16.mxu0 %v6342_v18 }
 0x322   :  { %5477 = vmatprep.subr.bf16.mxu1 %v6343_v19 }
 0x323   :  { %4156 = vmatmul.mubr.bf16.vlgmr.msra.gmra.mrb[16].mxu0 %v740_v41 }
 0x324   :  { %4484 = vmatmul.mubr.bf16.vlgmr.msra.gmra.mrb[16].mxu1 %v740_v41  ;;  %5456 = vmatpush3.bf16.msra.mxu0 %v6344_v20 }
 0x325   :  { %5478 = vmatpush3.bf16.msra.mxu1 %v6345_v25  ;;  %5457 = vmatprep.subr.bf16.mxu0 %v6346_v22 }
 0x326   :  { %5479 = vmatprep.subr.bf16.mxu1 %v6347_v23 }
 0x328   :  { %5458 = vmatpush3.bf16.msra.mxu0 %v6348_v24 }
 0x329   :  { %5480 = vmatpush3.bf16.msra.mxu1 %v6349_v36  ;;  %5459 = vmatprep.subr.bf16.mxu0 %v6350_v26 }
 0x32a   :  { %5481 = vmatprep.subr.bf16.mxu1 %v6351_v28 }
 0x32c   :  { %5460 = vmatpush3.bf16.msra.mxu0 %v6352_v31 }
 0x32d   :  { %5482 = vmatpush3.bf16.msra.mxu1 %v6353_v30  ;;  %5461 = vmatprep.subr.bf16.mxu0 %v6354_v32 }
 0x32e   :  { %5483 = vmatprep.subr.bf16.mxu1 %v6355_v33 }
 0x330   :  { %5462 = vmatpush3.bf16.msra.mxu0 %v6356_v35 }
 0x331   :  { %5484 = vmatpush3.bf16.msra.mxu1 %v6357_v38  ;;  %5463 = vmatprep.subr.bf16.mxu0 %v6358_v7 }
 0x332   :  { %5485 = vmatprep.subr.bf16.mxu1 %v6359_v14 }
 0x334   :  { %5464 = vmatpush3.bf16.msra.mxu0 %v6360_v40 }
 0x335   :  { %5486 = vmatpush3.bf16.msra.mxu1 %v6361_v42  ;;  %5465 = vmatprep.subr.bf16.mxu0 %v6362_v43 }
 0x336   :  { %5487 = vmatprep.subr.bf16.mxu1 %v6363_v44 }
 0x338   :  { %5466 = vmatpush3.bf16.msra.mxu0 %v6364_v45 }
 0x339   :  { %5488 = vmatpush3.bf16.msra.mxu1 %v6365_v13  ;;  %5467 = vmatprep.subr.bf16.mxu0 %v6366_v39 }
 0x33a   :  { %5489 = vmatprep.subr.bf16.mxu1 %v6367_v46 }
 0x33c   :  { %5468 = vmatpush3.bf16.msra.mxu0 %v6368_v21 }
 0x33d   :  { %5490 = vmatpush3.bf16.msra.mxu1 %v6369_v57  ;;  %5469 = vmatprep.subr.bf16.mxu0 %v6370_v47 }
 0x33e   :  { %5491 = vmatprep.subr.bf16.mxu1 %v6371_v48 }
 0x340   :  { %5470 = vmatpush3.bf16.msra.mxu0 %v6372_v50 }
 0x341   :  { %5492 = vmatpush3.bf16.msra.mxu1 %v6373_v37 }
 0x3f6   :  { %v4157_v56 = vpop.f32.mrb[16].mxu0 }
 0x3f7   :  { %v5499_v58 = vadd.f32 %v4157_v56, %v1259_v53  ;;  %v4485_v59 = vpop.f32.mrb[16].mxu1  ;;  %v4159_v52 = vpop.f32.mrb[17].mxu0 }
 0x3f8   :  { %v5501_v62 = vadd.f32 %v4485_v59, %v1267_v54  ;;  %v5500_v63 = vadd.f32 %v4159_v52, %v1263_v55  ;;  %v4487_v1 = vpop.f32.mrb[17].mxu1  ;;  %v4161_v2 = vpop.f32.mrb[18].mxu0 }
 0x3f9   :  { %v5502_v4 = vadd.f32 %v4487_v1, %v1271_v29  ;;  %v4489_v5 = vpop.f32.mrb[18].mxu1  ;;  %v4162_v3 = vpop.f32.mrb[19].mxu0  ;;  %v4492_v9 = vpack.c.bf16 %v5499_v58, %v5499_v58 }
 0x3fa   :  { %v4493_v60 = vpack.c.bf16 %v5500_v63, %v5500_v63  ;;  %v4490_v6 = vpop.f32.mrb[19].mxu1  ;;  %v4494_v49 = vpack.c.bf16 %v5501_v62, %v5501_v62 }
 0x3fb   :  { %v4495_v11 = vpack.c.bf16 %v5502_v4, %v5502_v4 }
 0x3fc   :  { %4791 = vmatprep.mubr.bf16.mxu0 %v4493_v60 }
 0x3fd   :  { %4831 = vmatprep.mubr.bf16.mxu1 %v4495_v11  ;;  %4792 = vmatmul.mubr.bf16.vlgmr.msra.gmra.mrb[20].mxu0 %v4492_v9 }
 0x3fe   :  { %4832 = vmatmul.mubr.bf16.vlgmr.msra.gmra.mrb[20].mxu1 %v4494_v49 }
 0x4d0   :  { %v5471_v10 = vpop.f32.mrb[20].mxu0 }
 0x4d1   :  { %v5493_v0 = vpop.f32.mrb[20].mxu1  ;;  %v5472_v16 = vpop.f32.mrb[21].mxu0 }
 0x4d2   :  { %v5473_v17 = vadd.f32 %v5472_v16, %v5471_v10  ;;  %v5494_v61 = vpop.f32.mrb[21].mxu1  ;;  %v5474_v8 = vpop.f32.mrb[22].mxu0 }
 0x4d3   :  { %v5495_v15 = vadd.f32 %v5494_v61, %v5493_v0  ;;  %v5496_v34 = vpop.f32.mrb[22].mxu1  ;;  %v5475_v27 = vpop.f32.mrb[23].mxu0 }
 0x4d4   :  { %v4794_v18 = vadd.f32 %v5473_v17, %v5422_v12  ;;  %v5497_v19 = vpop.f32.mrb[23].mxu1 }
 0x4d6   :  { %v4834_v20 = vadd.f32 %v5495_v15, %v4794_v18 }
 0x4d8   :  { %4842 = vrot.lane.b32.xlu0 %v4834_v20, %s6555_s6  ;;  %4840 = vst.msk [vmem:[%s6834_s7] sm:$0xff] %vm4839_vm1, %v4834_v20 }
 0x54a   :  { %v4843_v41 = vpop.permute.xlu0 %4842 }
 0x54b   :  { %v4845_v25 = vsub.f32 %v4834_v20, %v4843_v41 }
 0x54d   :  { %v4846_v22 = vmul.f32 1.442695, %v4845_v25 }
 0x54f   :  { %6374 = vpow2.f32 %v4846_v22 }
 0x559   :  { %v6375_v23 = vpop.eup %6374 }
 0x55a   :  { %v4848_v24 = vadd.f32 1.0, %v6375_v23 }
 0x55c   :  { %6376 = vrcp.f32 %v4848_v24 }
 0x566   :  { %v6377_v36 = vpop.eup %6376 }
 0x567   :  { %4852 = vrot.lane.b32.xlu0 %v6377_v36, %s6556_s0  ;;  %v4850_v26 = vsub.f32 1.0, %v6377_v36 }
 0x5d9   :  { %v4853_v28 = vpop.permute.xlu0 %4852 }
 0x5da   :  { %v4856_v31 = vsel %vm4855_vm2, %v4850_v26, %v4853_v28 }
 0x5db   :  { %4857 = vst.msk [vmem:[%s6835_s8] sm:$0xff] %vm4839_vm1, %v4856_v31 }
 0x5dc   :  { %4866 = vsyncpa [#allocation3], 1 }
 0x5dd   :  { %4867 = vsyncpa [#allocation5], 1 }
 0x5de   :  { %4868 = vsyncpa [#allocation8], 1 }
 0x5df   :  { %4869 = vsyncpa [#allocation11], 1 }

</bundles_post_ra>
